<compile_context>
chip_gen: v5e
topology: v5e:2x2
jax: 0.10.0
libtpu: 0.0.40
codegen_flags: <defaults>
</compile_context>

<pallas_src>
import functools

import jax
import jax.numpy as jnp
import numpy as np
from jax import lax
from jax.experimental import pallas as pl
from jax.experimental.pallas import tpu as pltpu

EPS = 1e-5  # torch.nn.LayerNorm default


def _layernorm(x, w, b):
    mu = jnp.mean(x, axis=-1, keepdims=True)
    var = jnp.mean((x - mu) ** 2, axis=-1, keepdims=True)  # biased, like torch
    return (x - mu) * jax.lax.rsqrt(var + EPS) * w + b


def _device_vmem_bytes():
    """Physical VMEM per TensorCore; conservative fallback if the query fails."""
    try:
        cap = getattr(pltpu.get_tpu_info(), "vmem_capacity_bytes", None)
        if cap:
            return int(cap)
    except Exception:
        pass
    return 64 << 20  # v7x per-TC VMEM -- safe lower bound across v5e/v6e/v7x


def block_kernel(x_ref, wqkv_ref, wp_ref, bp_ref,
                 ln1w_ref, ln1b_ref, ln2w_ref, ln2b_ref,
                 w1_ref, b1_ref, w2_ref, b2_ref, o_ref,
                 *, n_head, head_size, compute_dtype):
    """One grid step = Bb batch elements. Entire transformer block fused."""
    Bb, T, C = x_ref.shape
    HS = n_head * head_size
    f32 = jnp.float32
    approx = (jnp.dtype(compute_dtype) == jnp.dtype(jnp.bfloat16))

    x = x_ref[...].astype(f32)                   # (Bb, T, C)
    x2 = x.reshape(Bb * T, C)                    # free: last dim unchanged

    # ---- LayerNorm 1 (f32) ----
    xn = _layernorm(x2, ln1w_ref[0], ln1b_ref[0])                 # (Bb*T, C)

    # ---- fused QKV projection: single full-width MXU matmul ----
    # Cast the result to compute_dtype right away: halves the live (M, 3C)
    # buffer and avoids 3*H per-slice casts inside the unrolled head loop.
    qkv = jnp.dot(xn.astype(compute_dtype), wqkv_ref[...],
                  preferred_element_type=f32).astype(compute_dtype)

    # ---- causal mask (T, T), finite large-negative (NaN-safe) ----
    row = lax.broadcasted_iota(jnp.int32, (T, T), 0)
    col = lax.broadcasted_iota(jnp.int32, (T, T), 1)
    causal = col <= row
    neg = jnp.float32(-1e30)

    # ---- multi-head attention; heads statically unrolled, batched over Bb ----
    head_outs = []
    for h in range(n_head):
        q = qkv[:, h * head_size:(h + 1) * head_size].reshape(Bb, T, head_size)
        k = qkv[:, HS + h * head_size:
                HS + (h + 1) * head_size].reshape(Bb, T, head_size)
        v = qkv[:, 2 * HS + h * head_size:
                2 * HS + (h + 1) * head_size].reshape(Bb, T, head_size)

        # scores: contract last dims directly (no explicit transpose of k)
        s = lax.dot_general(q, k, (((2,), (2,)), ((0,), (0,))),
                            preferred_element_type=f32)          # (Bb, T, T)
        s = jnp.where(causal, s, neg)
        s = s - jnp.max(s, axis=-1, keepdims=True)
        p = jnp.exp(s)
        p = p * pl.reciprocal(jnp.sum(p, axis=-1, keepdims=True), approx=approx)

        # out_h = p @ v, batched over Bb
        o_h = lax.dot_general(p.astype(compute_dtype), v,
                              (((2,), (1,)), ((0,), (0,))),
                              preferred_element_type=f32)        # (Bb, T, hs)
        head_outs.append(o_h.reshape(Bb * T, head_size).astype(compute_dtype))

    # lane-concatenate head outputs, then ONE full-K projection matmul
    heads = jnp.concatenate(head_outs, axis=-1)                  # (Bb*T, C)
    attn = jnp.dot(heads, wp_ref[...], preferred_element_type=f32)

    x1 = x2 + attn + bp_ref[0]                                   # residual 1

    # ---- LayerNorm 2 + FeedForward ----
    xn2 = _layernorm(x1, ln2w_ref[0], ln2b_ref[0])
    h1 = jnp.dot(xn2.astype(compute_dtype), w1_ref[...],
                 preferred_element_type=f32) + b1_ref[0]
    h1 = jnp.maximum(h1, 0.0).astype(compute_dtype)              # ReLU
    ff = jnp.dot(h1, w2_ref[...], preferred_element_type=f32) + b2_ref[0]

    o_ref[...] = (x1 + ff).reshape(Bb, T, C).astype(o_ref.dtype)  # residual 2


def transformer_block(x, params, *, compute_dtype=jnp.bfloat16,
                      block_batch=None, out_dtype=None):
    B, T, C = x.shape
    H, _, hs = params["wq"].shape
    HS = H * hs
    assert HS == C, "n_embd must equal n_head * head_size"
    scale = float(hs) ** -0.5
    f32 = jnp.float32
    out_dtype = x.dtype if out_dtype is None else out_dtype
    cd_bytes = jnp.dtype(compute_dtype).itemsize

    # ---- wrapper-side weight re-packing (free, done once under jit/XLA) ----
    def stack_heads(w):  # (H, C, hs) -> (C, H*hs); column block h == w[h]
        return jnp.transpose(w, (1, 0, 2)).reshape(C, HS)

    wqkv = jnp.concatenate(
        [stack_heads(params["wq"]) * scale,        # fold 1/sqrt(hs) into Q
         stack_heads(params["wk"]),
         stack_heads(params["wv"])], axis=-1).astype(compute_dtype)  # (C, 3C)
    wp = params["wp"].astype(compute_dtype)                          # (C, C)
    w1 = params["w1"].astype(compute_dtype)                          # (C, 4C)
    w2 = params["w2"].astype(compute_dtype)                          # (4C, C)

    bp = params["bp"].astype(f32)
    ln1w, ln1b = params["ln1w"].astype(f32), params["ln1b"].astype(f32)
    ln2w, ln2b = params["ln2w"].astype(f32), params["ln2b"].astype(f32)
    b1, b2 = params["b1"].astype(f32), params["b2"].astype(f32)

    weights = [wqkv, wp, bp, ln1w, ln1b, ln2w, ln2b, w1, b1, w2, b2]
    wbytes = sum(int(w.size) * w.dtype.itemsize for w in weights)

    # ---- batch blocking: ~512 rows per step, but keep >= 2 grid steps so the
    # "parallel" batch axis can shard across v7x's two TensorCores. ----
    if block_batch is None:
        target_rows = 512
        bb = 1
        for d in range(1, B + 1):
            if B % d:
                continue
            if d > 1 and d * T > target_rows:
                continue
            if B >= 2 and B // d < 2:
                continue
            bb = d
        block_batch = bb
    Bb = block_batch
    assert B % Bb == 0, "block_batch must divide batch size"

    # ---- VMEM budget from the real working set, clamped to device capacity ----
    def act_bytes(bb):
        M = bb * T
        a = 0
        a += 2 * 2 * M * C * x.dtype.itemsize       # x in / out blocks, dbl-buffered
        a += M * 3 * C * cd_bytes                   # fused qkv
        a += 2 * bb * T * T * 4                     # per-head scores + probs (f32)
        a += 2 * M * C * cd_bytes                   # head-output slab + concat copy
        a += M * 4 * C * (4 + cd_bytes)             # h1 (f32 + compute-dtype copy)
        a += 4 * M * C * 4                          # xn, attn, x1, xn2 temporaries
        return a

    vmem_cap = _device_vmem_bytes()
    budget_cap = max(32 << 20, vmem_cap - (8 << 20))
    while Bb > 1 and wbytes + act_bytes(Bb) > budget_cap:
        Bb = max(d for d in range(1, Bb) if B % d == 0)
    # 2*wbytes covers the double-buffered-weights fallback path.
    vmem_limit = int(min(budget_cap,
                         max(32 << 20, 2 * wbytes + act_bytes(Bb) + (8 << 20))))

    kernel = functools.partial(block_kernel, n_head=H, head_size=hs,
                               compute_dtype=compute_dtype)
    x_spec = pl.BlockSpec((Bb, T, C), lambda b: (b, 0, 0))
    out_spec = pl.BlockSpec((Bb, T, C), lambda b: (b, 0, 0))

    def build(single_buffer_weights):
        def wspec(a):
            nd = a.ndim
            idx = lambda b, _nd=nd: (0,) * _nd
            if single_buffer_weights:
                # grid-invariant block: no re-DMA happens, so 1 buffer suffices
                return pl.BlockSpec(a.shape, idx, pipeline_mode=pl.Buffered(1))
            return pl.BlockSpec(a.shape, idx)

        return pl.pallas_call(
            kernel,
            out_shape=jax.ShapeDtypeStruct((B, T, C), out_dtype),
            grid_spec=pltpu.PrefetchScalarGridSpec(
                num_scalar_prefetch=0,
                grid=(B // Bb,),
                in_specs=[x_spec] + [wspec(w) for w in weights],
                out_specs=out_spec,
            ),
            compiler_params=pltpu.CompilerParams(
                dimension_semantics=("parallel",),
                vmem_limit_bytes=vmem_limit),
        )

    try:
        return build(True)(x, *weights)
    except Exception:
        # Fallback for jax versions where pipeline_mode=pl.Buffered(1) is not
        # accepted on pallas_call operands: default double-buffered weights.
        return build(False)(x, *weights)


# ---------- pure-JAX reference (mirrors the PyTorch forward) ----------
def reference_block(x, p):
    def ln(z, w, b):
        mu = z.mean(-1, keepdims=True)
        var = ((z - mu) ** 2).mean(-1, keepdims=True)
        return (z - mu) / jnp.sqrt(var + EPS) * w[0] + b[0]

    B, T, C = x.shape
    H, _, hs = p["wq"].shape
    xn = ln(x, p["ln1w"], p["ln1b"])
    causal = jnp.tril(jnp.ones((T, T), bool))
    outs = []
    for h in range(H):
        q = xn @ p["wq"][h]
        k = xn @ p["wk"][h]
        v = xn @ p["wv"][h]
        s = (q @ jnp.swapaxes(k, -1, -2)) * hs ** -0.5
        s = jnp.where(causal, s, -jnp.inf)
        w = jax.nn.softmax(s, axis=-1)
        outs.append(w @ v)
    attn = jnp.concatenate(outs, -1) @ p["wp"] + p["bp"][0]
    x = x + attn
    xn2 = ln(x, p["ln2w"], p["ln2b"])
    ff = jnp.maximum(xn2 @ p["w1"] + p["b1"][0], 0.0) @ p["w2"] + p["b2"][0]
    return x + ff


if __name__ == "__main__":
    # Small GPTConfig-consistent shapes: batch=2, block_size(T)=8, n_embd=32, n_head=4
    B, T, C, H = 2, 8, 32, 4
    hs = C // H

    key = jax.random.PRNGKey(0)
    ks = jax.random.split(key, 12)
    s = 0.02
    params = {
        "wq": jax.random.normal(ks[0], (H, C, hs), jnp.float32) * s,
        "wk": jax.random.normal(ks[1], (H, C, hs), jnp.float32) * s,
        "wv": jax.random.normal(ks[2], (H, C, hs), jnp.float32) * s,
        "wp": jax.random.normal(ks[3], (C, C), jnp.float32) * s,
        "bp": jax.random.normal(ks[4], (1, C), jnp.float32) * s,
        "ln1w": jnp.ones((1, C), jnp.float32),
        "ln1b": jnp.zeros((1, C), jnp.float32),
        "ln2w": jnp.ones((1, C), jnp.float32),
        "ln2b": jnp.zeros((1, C), jnp.float32),
        "w1": jax.random.normal(ks[5], (C, 4 * C), jnp.float32) * s,
        "b1": jax.random.normal(ks[6], (1, 4 * C), jnp.float32) * s,
        "w2": jax.random.normal(ks[7], (4 * C, C), jnp.float32) * s,
        "b2": jax.random.normal(ks[8], (1, C), jnp.float32) * s,
    }
    x = jax.random.normal(ks[9], (B, T, C), jnp.float32)

    ref = reference_block(x, params)

    # f32 matmul-operand path: strict check
    out_f32 = jax.block_until_ready(
        transformer_block(x, params, compute_dtype=jnp.float32))
    np.testing.assert_allclose(np.asarray(out_f32), np.asarray(ref),
                               rtol=1e-5, atol=1e-5)

    # bf16 matmul-operand path (production default for throughput): loose check
    out_bf16 = jax.block_until_ready(
        transformer_block(x, params, compute_dtype=jnp.bfloat16))
    np.testing.assert_allclose(np.asarray(out_bf16), np.asarray(ref),
                               rtol=2e-2, atol=2e-2)

    print("KERNEL_OK")
</pallas_src>

<mosaic_0001>
module attributes {stable_mosaic.version = 11 : i64} {
  func.func @block_kernel(%arg0: i32, %arg1: memref<1x8x32xf32, #tpu.memory_space<vmem>>, %arg2: memref<32x96xf32, #tpu.memory_space<vmem>>, %arg3: memref<32x32xf32, #tpu.memory_space<vmem>>, %arg4: memref<1x32xf32, #tpu.memory_space<vmem>>, %arg5: memref<1x32xf32, #tpu.memory_space<vmem>>, %arg6: memref<1x32xf32, #tpu.memory_space<vmem>>, %arg7: memref<1x32xf32, #tpu.memory_space<vmem>>, %arg8: memref<1x32xf32, #tpu.memory_space<vmem>>, %arg9: memref<32x128xf32, #tpu.memory_space<vmem>>, %arg10: memref<1x128xf32, #tpu.memory_space<vmem>>, %arg11: memref<128x32xf32, #tpu.memory_space<vmem>>, %arg12: memref<1x32xf32, #tpu.memory_space<vmem>>, %arg13: memref<1x8x32xf32, #tpu.memory_space<vmem>>) attributes {dimension_semantics = [#tpu.dimension_semantics<parallel>], iteration_bounds = array<i64: 2>, scalar_prefetch = 0 : i64, scratch_operands = 0 : i64, tpu.core_type = #tpu.core_type<tc>, window_params = [{transform_indices = @transform_0, window_bounds = array<i64: 1, 8, 32>}, {pipeline_mode = #tpu.pipeline_mode<synchronous>, transform_indices = @transform_1, window_bounds = array<i64: 32, 96>}, {pipeline_mode = #tpu.pipeline_mode<synchronous>, transform_indices = @transform_2, window_bounds = array<i64: 32, 32>}, {pipeline_mode = #tpu.pipeline_mode<synchronous>, transform_indices = @transform_3, window_bounds = array<i64: 1, 32>}, {pipeline_mode = #tpu.pipeline_mode<synchronous>, transform_indices = @transform_4, window_bounds = array<i64: 1, 32>}, {pipeline_mode = #tpu.pipeline_mode<synchronous>, transform_indices = @transform_5, window_bounds = array<i64: 1, 32>}, {pipeline_mode = #tpu.pipeline_mode<synchronous>, transform_indices = @transform_6, window_bounds = array<i64: 1, 32>}, {pipeline_mode = #tpu.pipeline_mode<synchronous>, transform_indices = @transform_7, window_bounds = array<i64: 1, 32>}, {pipeline_mode = #tpu.pipeline_mode<synchronous>, transform_indices = @transform_8, window_bounds = array<i64: 32, 128>}, {pipeline_mode = #tpu.pipeline_mode<synchronous>, transform_indices = @transform_9, window_bounds = array<i64: 1, 128>}, {pipeline_mode = #tpu.pipeline_mode<synchronous>, transform_indices = @transform_10, window_bounds = array<i64: 128, 32>}, {pipeline_mode = #tpu.pipeline_mode<synchronous>, transform_indices = @transform_11, window_bounds = array<i64: 1, 32>}, {transform_indices = @transform_12, window_bounds = array<i64: 1, 8, 32>}]} {
    %c0 = arith.constant 0 : index
    %c0_0 = arith.constant 0 : index
    %c0_1 = arith.constant 0 : index
    %0 = vector.load %arg1[%c0, %c0_0, %c0_1] : memref<1x8x32xf32, #tpu.memory_space<vmem>>, vector<1x8x32xf32>
    %1 = vector.shape_cast %0 : vector<1x8x32xf32> to vector<8x32xf32>
    %c0_2 = arith.constant 0 : index
    %c0_3 = arith.constant 0 : index
    %2 = vector.load %arg5[%c0_2, %c0_3] : memref<1x32xf32, #tpu.memory_space<vmem>>, vector<1x32xf32>
    %3 = vector.shape_cast %2 : vector<1x32xf32> to vector<32xf32>
    %c0_4 = arith.constant 0 : index
    %c0_5 = arith.constant 0 : index
    %4 = vector.load %arg6[%c0_4, %c0_5] : memref<1x32xf32, #tpu.memory_space<vmem>>, vector<1x32xf32>
    %5 = vector.shape_cast %4 : vector<1x32xf32> to vector<32xf32>
    %cst = arith.constant dense<0.000000e+00> : vector<8xf32>
    %6 = vector.multi_reduction <add>, %1, %cst [1] : vector<8x32xf32> to vector<8xf32>
    %7 = vector.shape_cast %6 : vector<8xf32> to vector<8x1xf32>
    %cst_6 = arith.constant 3.200000e+01 : f32
    %8 = vector.broadcast %cst_6 : f32 to vector<8x1xf32>
    %9 = arith.divf %7, %8 : vector<8x1xf32>
    %10 = vector.broadcast %9 : vector<8x1xf32> to vector<8x32xf32>
    %11 = arith.subf %1, %10 : vector<8x32xf32>
    %12 = arith.mulf %11, %11 : vector<8x32xf32>
    %cst_7 = arith.constant dense<0.000000e+00> : vector<8xf32>
    %13 = vector.multi_reduction <add>, %12, %cst_7 [1] : vector<8x32xf32> to vector<8xf32>
    %14 = vector.shape_cast %13 : vector<8xf32> to vector<8x1xf32>
    %cst_8 = arith.constant 3.200000e+01 : f32
    %15 = vector.broadcast %cst_8 : f32 to vector<8x1xf32>
    %16 = arith.divf %14, %15 : vector<8x1xf32>
    %17 = vector.broadcast %9 : vector<8x1xf32> to vector<8x32xf32>
    %18 = arith.subf %1, %17 : vector<8x32xf32>
    %cst_9 = arith.constant 9.99999974E-6 : f32
    %19 = vector.broadcast %cst_9 : f32 to vector<8x1xf32>
    %20 = arith.addf %16, %19 : vector<8x1xf32>
    %21 = math.rsqrt %20 : vector<8x1xf32>
    %22 = vector.broadcast %21 : vector<8x1xf32> to vector<8x32xf32>
    %23 = arith.mulf %18, %22 : vector<8x32xf32>
    %24 = vector.shape_cast %3 : vector<32xf32> to vector<1x32xf32>
    %25 = vector.broadcast %24 : vector<1x32xf32> to vector<8x32xf32>
    %26 = arith.mulf %23, %25 : vector<8x32xf32>
    %27 = vector.shape_cast %5 : vector<32xf32> to vector<1x32xf32>
    %28 = vector.broadcast %27 : vector<1x32xf32> to vector<8x32xf32>
    %29 = arith.addf %26, %28 : vector<8x32xf32>
    %c0_10 = arith.constant 0 : index
    %c0_11 = arith.constant 0 : index
    %30 = vector.load %arg2[%c0_10, %c0_11] : memref<32x96xf32, #tpu.memory_space<vmem>>, vector<32x96xf32>
    %cst_12 = arith.constant dense<0.000000e+00> : vector<8x96xf32>
    %31 = tpu.matmul %29, %30, %cst_12 {dimension_numbers = #tpu.dot_dimension_numbers<[1], [0], [0], [1], [0, 0, 1, 1], [], []>} : vector<8x32xf32>, vector<32x96xf32>, vector<8x96xf32> -> vector<8x96xf32>
    %32 = tpu.iota {dimensions = array<i32: 0>} : vector<8x8xi32>
    %33 = tpu.iota {dimensions = array<i32: 1>} : vector<8x8xi32>
    %34 = arith.cmpi sle, %33, %32 : vector<8x8xi32>
    %35 = vector.extract_strided_slice %31 {offsets = [0, 0], sizes = [8, 8], strides = [1, 1]} : vector<8x96xf32> to vector<8x8xf32>
    %36 = vector.shape_cast %35 : vector<8x8xf32> to vector<1x8x8xf32>
    %37 = vector.extract_strided_slice %31 {offsets = [0, 32], sizes = [8, 8], strides = [1, 1]} : vector<8x96xf32> to vector<8x8xf32>
    %38 = vector.shape_cast %37 : vector<8x8xf32> to vector<1x8x8xf32>
    %39 = vector.extract_strided_slice %31 {offsets = [0, 64], sizes = [8, 8], strides = [1, 1]} : vector<8x96xf32> to vector<8x8xf32>
    %40 = vector.shape_cast %39 : vector<8x8xf32> to vector<1x8x8xf32>
    %cst_13 = arith.constant dense<0.000000e+00> : vector<1x8x8xf32>
    %41 = tpu.matmul %36, %38, %cst_13 {dimension_numbers = #tpu.dot_dimension_numbers<[2], [2], [1], [1], [0, 0, 0, 1, 1, 1], [0], [0]>} : vector<1x8x8xf32>, vector<1x8x8xf32>, vector<1x8x8xf32> -> vector<1x8x8xf32>
    %cst_14 = arith.constant -1.000000e+30 : f32
    %42 = vector.shape_cast %34 : vector<8x8xi1> to vector<1x8x8xi1>
    %43 = vector.broadcast %cst_14 : f32 to vector<1x8x8xf32>
    %44 = arith.select %42, %41, %43 : vector<1x8x8xi1>, vector<1x8x8xf32>
    %cst_15 = arith.constant dense<0xFF800000> : vector<1x8xf32>
    %45 = vector.multi_reduction <maximumf>, %44, %cst_15 [2] : vector<1x8x8xf32> to vector<1x8xf32>
    %46 = vector.shape_cast %45 : vector<1x8xf32> to vector<1x8x1xf32>
    %47 = vector.broadcast %46 : vector<1x8x1xf32> to vector<1x8x8xf32>
    %48 = arith.subf %44, %47 : vector<1x8x8xf32>
    %49 = math.exp %48 : vector<1x8x8xf32>
    %cst_16 = arith.constant dense<0.000000e+00> : vector<1x8xf32>
    %50 = vector.multi_reduction <add>, %49, %cst_16 [2] : vector<1x8x8xf32> to vector<1x8xf32>
    %51 = vector.shape_cast %50 : vector<1x8xf32> to vector<1x8x1xf32>
    %52 = tpu.reciprocal %51 : vector<1x8x1xf32> -> vector<1x8x1xf32>
    %53 = vector.broadcast %52 : vector<1x8x1xf32> to vector<1x8x8xf32>
    %54 = arith.mulf %49, %53 : vector<1x8x8xf32>
    %cst_17 = arith.constant dense<0.000000e+00> : vector<1x8x8xf32>
    %55 = tpu.matmul %54, %40, %cst_17 {dimension_numbers = #tpu.dot_dimension_numbers<[2], [1], [1], [2], [0, 0, 0, 1, 1, 2], [0], [0]>} : vector<1x8x8xf32>, vector<1x8x8xf32>, vector<1x8x8xf32> -> vector<1x8x8xf32>
    %56 = vector.shape_cast %55 : vector<1x8x8xf32> to vector<8x8xf32>
    %57 = vector.extract_strided_slice %31 {offsets = [0, 8], sizes = [8, 8], strides = [1, 1]} : vector<8x96xf32> to vector<8x8xf32>
    %58 = vector.shape_cast %57 : vector<8x8xf32> to vector<1x8x8xf32>
    %59 = vector.extract_strided_slice %31 {offsets = [0, 40], sizes = [8, 8], strides = [1, 1]} : vector<8x96xf32> to vector<8x8xf32>
    %60 = vector.shape_cast %59 : vector<8x8xf32> to vector<1x8x8xf32>
    %61 = vector.extract_strided_slice %31 {offsets = [0, 72], sizes = [8, 8], strides = [1, 1]} : vector<8x96xf32> to vector<8x8xf32>
    %62 = vector.shape_cast %61 : vector<8x8xf32> to vector<1x8x8xf32>
    %cst_18 = arith.constant dense<0.000000e+00> : vector<1x8x8xf32>
    %63 = tpu.matmul %58, %60, %cst_18 {dimension_numbers = #tpu.dot_dimension_numbers<[2], [2], [1], [1], [0, 0, 0, 1, 1, 1], [0], [0]>} : vector<1x8x8xf32>, vector<1x8x8xf32>, vector<1x8x8xf32> -> vector<1x8x8xf32>
    %cst_19 = arith.constant -1.000000e+30 : f32
    %64 = vector.shape_cast %34 : vector<8x8xi1> to vector<1x8x8xi1>
    %65 = vector.broadcast %cst_19 : f32 to vector<1x8x8xf32>
    %66 = arith.select %64, %63, %65 : vector<1x8x8xi1>, vector<1x8x8xf32>
    %cst_20 = arith.constant dense<0xFF800000> : vector<1x8xf32>
    %67 = vector.multi_reduction <maximumf>, %66, %cst_20 [2] : vector<1x8x8xf32> to vector<1x8xf32>
    %68 = vector.shape_cast %67 : vector<1x8xf32> to vector<1x8x1xf32>
    %69 = vector.broadcast %68 : vector<1x8x1xf32> to vector<1x8x8xf32>
    %70 = arith.subf %66, %69 : vector<1x8x8xf32>
    %71 = math.exp %70 : vector<1x8x8xf32>
    %cst_21 = arith.constant dense<0.000000e+00> : vector<1x8xf32>
    %72 = vector.multi_reduction <add>, %71, %cst_21 [2] : vector<1x8x8xf32> to vector<1x8xf32>
    %73 = vector.shape_cast %72 : vector<1x8xf32> to vector<1x8x1xf32>
    %74 = tpu.reciprocal %73 : vector<1x8x1xf32> -> vector<1x8x1xf32>
    %75 = vector.broadcast %74 : vector<1x8x1xf32> to vector<1x8x8xf32>
    %76 = arith.mulf %71, %75 : vector<1x8x8xf32>
    %cst_22 = arith.constant dense<0.000000e+00> : vector<1x8x8xf32>
    %77 = tpu.matmul %76, %62, %cst_22 {dimension_numbers = #tpu.dot_dimension_numbers<[2], [1], [1], [2], [0, 0, 0, 1, 1, 2], [0], [0]>} : vector<1x8x8xf32>, vector<1x8x8xf32>, vector<1x8x8xf32> -> vector<1x8x8xf32>
    %78 = vector.shape_cast %77 : vector<1x8x8xf32> to vector<8x8xf32>
    %79 = vector.extract_strided_slice %31 {offsets = [0, 16], sizes = [8, 8], strides = [1, 1]} : vector<8x96xf32> to vector<8x8xf32>
    %80 = vector.shape_cast %79 : vector<8x8xf32> to vector<1x8x8xf32>
    %81 = vector.extract_strided_slice %31 {offsets = [0, 48], sizes = [8, 8], strides = [1, 1]} : vector<8x96xf32> to vector<8x8xf32>
    %82 = vector.shape_cast %81 : vector<8x8xf32> to vector<1x8x8xf32>
    %83 = vector.extract_strided_slice %31 {offsets = [0, 80], sizes = [8, 8], strides = [1, 1]} : vector<8x96xf32> to vector<8x8xf32>
    %84 = vector.shape_cast %83 : vector<8x8xf32> to vector<1x8x8xf32>
    %cst_23 = arith.constant dense<0.000000e+00> : vector<1x8x8xf32>
    %85 = tpu.matmul %80, %82, %cst_23 {dimension_numbers = #tpu.dot_dimension_numbers<[2], [2], [1], [1], [0, 0, 0, 1, 1, 1], [0], [0]>} : vector<1x8x8xf32>, vector<1x8x8xf32>, vector<1x8x8xf32> -> vector<1x8x8xf32>
    %cst_24 = arith.constant -1.000000e+30 : f32
    %86 = vector.shape_cast %34 : vector<8x8xi1> to vector<1x8x8xi1>
    %87 = vector.broadcast %cst_24 : f32 to vector<1x8x8xf32>
    %88 = arith.select %86, %85, %87 : vector<1x8x8xi1>, vector<1x8x8xf32>
    %cst_25 = arith.constant dense<0xFF800000> : vector<1x8xf32>
    %89 = vector.multi_reduction <maximumf>, %88, %cst_25 [2] : vector<1x8x8xf32> to vector<1x8xf32>
    %90 = vector.shape_cast %89 : vector<1x8xf32> to vector<1x8x1xf32>
    %91 = vector.broadcast %90 : vector<1x8x1xf32> to vector<1x8x8xf32>
    %92 = arith.subf %88, %91 : vector<1x8x8xf32>
    %93 = math.exp %92 : vector<1x8x8xf32>
    %cst_26 = arith.constant dense<0.000000e+00> : vector<1x8xf32>
    %94 = vector.multi_reduction <add>, %93, %cst_26 [2] : vector<1x8x8xf32> to vector<1x8xf32>
    %95 = vector.shape_cast %94 : vector<1x8xf32> to vector<1x8x1xf32>
    %96 = tpu.reciprocal %95 : vector<1x8x1xf32> -> vector<1x8x1xf32>
    %97 = vector.broadcast %96 : vector<1x8x1xf32> to vector<1x8x8xf32>
    %98 = arith.mulf %93, %97 : vector<1x8x8xf32>
    %cst_27 = arith.constant dense<0.000000e+00> : vector<1x8x8xf32>
    %99 = tpu.matmul %98, %84, %cst_27 {dimension_numbers = #tpu.dot_dimension_numbers<[2], [1], [1], [2], [0, 0, 0, 1, 1, 2], [0], [0]>} : vector<1x8x8xf32>, vector<1x8x8xf32>, vector<1x8x8xf32> -> vector<1x8x8xf32>
    %100 = vector.shape_cast %99 : vector<1x8x8xf32> to vector<8x8xf32>
    %101 = vector.extract_strided_slice %31 {offsets = [0, 24], sizes = [8, 8], strides = [1, 1]} : vector<8x96xf32> to vector<8x8xf32>
    %102 = vector.shape_cast %101 : vector<8x8xf32> to vector<1x8x8xf32>
    %103 = vector.extract_strided_slice %31 {offsets = [0, 56], sizes = [8, 8], strides = [1, 1]} : vector<8x96xf32> to vector<8x8xf32>
    %104 = vector.shape_cast %103 : vector<8x8xf32> to vector<1x8x8xf32>
    %105 = vector.extract_strided_slice %31 {offsets = [0, 88], sizes = [8, 8], strides = [1, 1]} : vector<8x96xf32> to vector<8x8xf32>
    %106 = vector.shape_cast %105 : vector<8x8xf32> to vector<1x8x8xf32>
    %cst_28 = arith.constant dense<0.000000e+00> : vector<1x8x8xf32>
    %107 = tpu.matmul %102, %104, %cst_28 {dimension_numbers = #tpu.dot_dimension_numbers<[2], [2], [1], [1], [0, 0, 0, 1, 1, 1], [0], [0]>} : vector<1x8x8xf32>, vector<1x8x8xf32>, vector<1x8x8xf32> -> vector<1x8x8xf32>
    %cst_29 = arith.constant -1.000000e+30 : f32
    %108 = vector.shape_cast %34 : vector<8x8xi1> to vector<1x8x8xi1>
    %109 = vector.broadcast %cst_29 : f32 to vector<1x8x8xf32>
    %110 = arith.select %108, %107, %109 : vector<1x8x8xi1>, vector<1x8x8xf32>
    %cst_30 = arith.constant dense<0xFF800000> : vector<1x8xf32>
    %111 = vector.multi_reduction <maximumf>, %110, %cst_30 [2] : vector<1x8x8xf32> to vector<1x8xf32>
    %112 = vector.shape_cast %111 : vector<1x8xf32> to vector<1x8x1xf32>
    %113 = vector.broadcast %112 : vector<1x8x1xf32> to vector<1x8x8xf32>
    %114 = arith.subf %110, %113 : vector<1x8x8xf32>
    %115 = math.exp %114 : vector<1x8x8xf32>
    %cst_31 = arith.constant dense<0.000000e+00> : vector<1x8xf32>
    %116 = vector.multi_reduction <add>, %115, %cst_31 [2] : vector<1x8x8xf32> to vector<1x8xf32>
    %117 = vector.shape_cast %116 : vector<1x8xf32> to vector<1x8x1xf32>
    %118 = tpu.reciprocal %117 : vector<1x8x1xf32> -> vector<1x8x1xf32>
    %119 = vector.broadcast %118 : vector<1x8x1xf32> to vector<1x8x8xf32>
    %120 = arith.mulf %115, %119 : vector<1x8x8xf32>
    %cst_32 = arith.constant dense<0.000000e+00> : vector<1x8x8xf32>
    %121 = tpu.matmul %120, %106, %cst_32 {dimension_numbers = #tpu.dot_dimension_numbers<[2], [1], [1], [2], [0, 0, 0, 1, 1, 2], [0], [0]>} : vector<1x8x8xf32>, vector<1x8x8xf32>, vector<1x8x8xf32> -> vector<1x8x8xf32>
    %122 = vector.shape_cast %121 : vector<1x8x8xf32> to vector<8x8xf32>
    %123 = tpu.concatenate %56, %78, %100, %122 in 1 : vector<8x8xf32>, vector<8x8xf32>, vector<8x8xf32>, vector<8x8xf32> -> vector<8x32xf32>
    %c0_33 = arith.constant 0 : index
    %c0_34 = arith.constant 0 : index
    %124 = vector.load %arg3[%c0_33, %c0_34] : memref<32x32xf32, #tpu.memory_space<vmem>>, vector<32x32xf32>
    %cst_35 = arith.constant dense<0.000000e+00> : vector<8x32xf32>
    %125 = tpu.matmul %123, %124, %cst_35 {dimension_numbers = #tpu.dot_dimension_numbers<[1], [0], [0], [1], [0, 0, 1, 1], [], []>} : vector<8x32xf32>, vector<32x32xf32>, vector<8x32xf32> -> vector<8x32xf32>
    %126 = arith.addf %1, %125 : vector<8x32xf32>
    %c0_36 = arith.constant 0 : index
    %c0_37 = arith.constant 0 : index
    %127 = vector.load %arg4[%c0_36, %c0_37] : memref<1x32xf32, #tpu.memory_space<vmem>>, vector<1x32xf32>
    %128 = vector.shape_cast %127 : vector<1x32xf32> to vector<32xf32>
    %129 = vector.shape_cast %128 : vector<32xf32> to vector<1x32xf32>
    %130 = vector.broadcast %129 : vector<1x32xf32> to vector<8x32xf32>
    %131 = arith.addf %126, %130 : vector<8x32xf32>
    %c0_38 = arith.constant 0 : index
    %c0_39 = arith.constant 0 : index
    %132 = vector.load %arg7[%c0_38, %c0_39] : memref<1x32xf32, #tpu.memory_space<vmem>>, vector<1x32xf32>
    %133 = vector.shape_cast %132 : vector<1x32xf32> to vector<32xf32>
    %c0_40 = arith.constant 0 : index
    %c0_41 = arith.constant 0 : index
    %134 = vector.load %arg8[%c0_40, %c0_41] : memref<1x32xf32, #tpu.memory_space<vmem>>, vector<1x32xf32>
    %135 = vector.shape_cast %134 : vector<1x32xf32> to vector<32xf32>
    %cst_42 = arith.constant dense<0.000000e+00> : vector<8xf32>
    %136 = vector.multi_reduction <add>, %131, %cst_42 [1] : vector<8x32xf32> to vector<8xf32>
    %137 = vector.shape_cast %136 : vector<8xf32> to vector<8x1xf32>
    %cst_43 = arith.constant 3.200000e+01 : f32
    %138 = vector.broadcast %cst_43 : f32 to vector<8x1xf32>
    %139 = arith.divf %137, %138 : vector<8x1xf32>
    %140 = vector.broadcast %139 : vector<8x1xf32> to vector<8x32xf32>
    %141 = arith.subf %131, %140 : vector<8x32xf32>
    %142 = arith.mulf %141, %141 : vector<8x32xf32>
    %cst_44 = arith.constant dense<0.000000e+00> : vector<8xf32>
    %143 = vector.multi_reduction <add>, %142, %cst_44 [1] : vector<8x32xf32> to vector<8xf32>
    %144 = vector.shape_cast %143 : vector<8xf32> to vector<8x1xf32>
    %cst_45 = arith.constant 3.200000e+01 : f32
    %145 = vector.broadcast %cst_45 : f32 to vector<8x1xf32>
    %146 = arith.divf %144, %145 : vector<8x1xf32>
    %147 = vector.broadcast %139 : vector<8x1xf32> to vector<8x32xf32>
    %148 = arith.subf %131, %147 : vector<8x32xf32>
    %cst_46 = arith.constant 9.99999974E-6 : f32
    %149 = vector.broadcast %cst_46 : f32 to vector<8x1xf32>
    %150 = arith.addf %146, %149 : vector<8x1xf32>
    %151 = math.rsqrt %150 : vector<8x1xf32>
    %152 = vector.broadcast %151 : vector<8x1xf32> to vector<8x32xf32>
    %153 = arith.mulf %148, %152 : vector<8x32xf32>
    %154 = vector.shape_cast %133 : vector<32xf32> to vector<1x32xf32>
    %155 = vector.broadcast %154 : vector<1x32xf32> to vector<8x32xf32>
    %156 = arith.mulf %153, %155 : vector<8x32xf32>
    %157 = vector.shape_cast %135 : vector<32xf32> to vector<1x32xf32>
    %158 = vector.broadcast %157 : vector<1x32xf32> to vector<8x32xf32>
    %159 = arith.addf %156, %158 : vector<8x32xf32>
    %c0_47 = arith.constant 0 : index
    %c0_48 = arith.constant 0 : index
    %160 = vector.load %arg9[%c0_47, %c0_48] : memref<32x128xf32, #tpu.memory_space<vmem>>, vector<32x128xf32>
    %cst_49 = arith.constant dense<0.000000e+00> : vector<8x128xf32>
    %161 = tpu.matmul %159, %160, %cst_49 {dimension_numbers = #tpu.dot_dimension_numbers<[1], [0], [0], [1], [0, 0, 1, 1], [], []>} : vector<8x32xf32>, vector<32x128xf32>, vector<8x128xf32> -> vector<8x128xf32>
    %c0_50 = arith.constant 0 : index
    %c0_51 = arith.constant 0 : index
    %162 = vector.load %arg10[%c0_50, %c0_51] : memref<1x128xf32, #tpu.memory_space<vmem>>, vector<1x128xf32>
    %163 = vector.shape_cast %162 : vector<1x128xf32> to vector<128xf32>
    %164 = vector.shape_cast %163 : vector<128xf32> to vector<1x128xf32>
    %165 = vector.broadcast %164 : vector<1x128xf32> to vector<8x128xf32>
    %166 = arith.addf %161, %165 : vector<8x128xf32>
    %cst_52 = arith.constant 0.000000e+00 : f32
    %167 = vector.broadcast %cst_52 : f32 to vector<8x128xf32>
    %168 = arith.maximumf %166, %167 : vector<8x128xf32>
    %c0_53 = arith.constant 0 : index
    %c0_54 = arith.constant 0 : index
    %169 = vector.load %arg11[%c0_53, %c0_54] : memref<128x32xf32, #tpu.memory_space<vmem>>, vector<128x32xf32>
    %cst_55 = arith.constant dense<0.000000e+00> : vector<8x32xf32>
    %170 = tpu.matmul %168, %169, %cst_55 {dimension_numbers = #tpu.dot_dimension_numbers<[1], [0], [0], [1], [0, 0, 1, 1], [], []>} : vector<8x128xf32>, vector<128x32xf32>, vector<8x32xf32> -> vector<8x32xf32>
    %c0_56 = arith.constant 0 : index
    %c0_57 = arith.constant 0 : index
    %171 = vector.load %arg12[%c0_56, %c0_57] : memref<1x32xf32, #tpu.memory_space<vmem>>, vector<1x32xf32>
    %172 = vector.shape_cast %171 : vector<1x32xf32> to vector<32xf32>
    %173 = vector.shape_cast %172 : vector<32xf32> to vector<1x32xf32>
    %174 = vector.broadcast %173 : vector<1x32xf32> to vector<8x32xf32>
    %175 = arith.addf %170, %174 : vector<8x32xf32>
    %176 = arith.addf %131, %175 : vector<8x32xf32>
    %177 = vector.shape_cast %176 : vector<8x32xf32> to vector<1x8x32xf32>
    %c0_58 = arith.constant 0 : index
    %c0_59 = arith.constant 0 : index
    %c0_60 = arith.constant 0 : index
    %178 = vector.load %arg13[%c0_58, %c0_59, %c0_60] : memref<1x8x32xf32, #tpu.memory_space<vmem>>, vector<1x8x32xf32>
    tpu.vector_store %arg13[%c0_58, %c0_59, %c0_60], %177 {strides = array<i32>} : memref<1x8x32xf32, #tpu.memory_space<vmem>>, vector<1x8x32xf32>,
    return
  }
  func.func @transform_0(%arg0: i32) -> (i32, i32, i32) {
    %c0_i32 = arith.constant 0 : i32
    %c0_i32_0 = arith.constant 0 : i32
    %c0_i32_1 = arith.constant 0 : i32
    return %arg0, %c0_i32, %c0_i32_0 : i32, i32, i32
  }
  func.func @transform_1(%arg0: i32) -> (i32, i32) {
    %c0_i32 = arith.constant 0 : i32
    %c0_i32_0 = arith.constant 0 : i32
    %c0_i32_1 = arith.constant 0 : i32
    return %c0_i32, %c0_i32_0 : i32, i32
  }
  func.func @transform_2(%arg0: i32) -> (i32, i32) {
    %c0_i32 = arith.constant 0 : i32
    %c0_i32_0 = arith.constant 0 : i32
    %c0_i32_1 = arith.constant 0 : i32
    return %c0_i32, %c0_i32_0 : i32, i32
  }
  func.func @transform_3(%arg0: i32) -> (i32, i32) {
    %c0_i32 = arith.constant 0 : i32
    %c0_i32_0 = arith.constant 0 : i32
    %c0_i32_1 = arith.constant 0 : i32
    return %c0_i32, %c0_i32_0 : i32, i32
  }
  func.func @transform_4(%arg0: i32) -> (i32, i32) {
    %c0_i32 = arith.constant 0 : i32
    %c0_i32_0 = arith.constant 0 : i32
    %c0_i32_1 = arith.constant 0 : i32
    return %c0_i32, %c0_i32_0 : i32, i32
  }
  func.func @transform_5(%arg0: i32) -> (i32, i32) {
    %c0_i32 = arith.constant 0 : i32
    %c0_i32_0 = arith.constant 0 : i32
    %c0_i32_1 = arith.constant 0 : i32
    return %c0_i32, %c0_i32_0 : i32, i32
  }
  func.func @transform_6(%arg0: i32) -> (i32, i32) {
    %c0_i32 = arith.constant 0 : i32
    %c0_i32_0 = arith.constant 0 : i32
    %c0_i32_1 = arith.constant 0 : i32
    return %c0_i32, %c0_i32_0 : i32, i32
  }
  func.func @transform_7(%arg0: i32) -> (i32, i32) {
    %c0_i32 = arith.constant 0 : i32
    %c0_i32_0 = arith.constant 0 : i32
    %c0_i32_1 = arith.constant 0 : i32
    return %c0_i32, %c0_i32_0 : i32, i32
  }
  func.func @transform_8(%arg0: i32) -> (i32, i32) {
    %c0_i32 = arith.constant 0 : i32
    %c0_i32_0 = arith.constant 0 : i32
    %c0_i32_1 = arith.constant 0 : i32
    return %c0_i32, %c0_i32_0 : i32, i32
  }
  func.func @transform_9(%arg0: i32) -> (i32, i32) {
    %c0_i32 = arith.constant 0 : i32
    %c0_i32_0 = arith.constant 0 : i32
    %c0_i32_1 = arith.constant 0 : i32
    return %c0_i32, %c0_i32_0 : i32, i32
  }
  func.func @transform_10(%arg0: i32) -> (i32, i32) {
    %c0_i32 = arith.constant 0 : i32
    %c0_i32_0 = arith.constant 0 : i32
    %c0_i32_1 = arith.constant 0 : i32
    return %c0_i32, %c0_i32_0 : i32, i32
  }
  func.func @transform_11(%arg0: i32) -> (i32, i32) {
    %c0_i32 = arith.constant 0 : i32
    %c0_i32_0 = arith.constant 0 : i32
    %c0_i32_1 = arith.constant 0 : i32
    return %c0_i32, %c0_i32_0 : i32, i32
  }
  func.func @transform_12(%arg0: i32) -> (i32, i32, i32) {
    %c0_i32 = arith.constant 0 : i32
    %c0_i32_0 = arith.constant 0 : i32
    %c0_i32_1 = arith.constant 0 : i32
    return %arg0, %c0_i32, %c0_i32_0 : i32, i32, i32
  }
}

module attributes {stable_mosaic.version = 11 : i64} {
  func.func @block_kernel(%arg0: i32, %arg1: memref<1x8x32xf32, #tpu.memory_space<vmem>>, %arg2: memref<32x96xf32, #tpu.memory_space<vmem>>, %arg3: memref<32x32xf32, #tpu.memory_space<vmem>>, %arg4: memref<1x32xf32, #tpu.memory_space<vmem>>, %arg5: memref<1x32xf32, #tpu.memory_space<vmem>>, %arg6: memref<1x32xf32, #tpu.memory_space<vmem>>, %arg7: memref<1x32xf32, #tpu.memory_space<vmem>>, %arg8: memref<1x32xf32, #tpu.memory_space<vmem>>, %arg9: memref<32x128xf32, #tpu.memory_space<vmem>>, %arg10: memref<1x128xf32, #tpu.memory_space<vmem>>, %arg11: memref<128x32xf32, #tpu.memory_space<vmem>>, %arg12: memref<1x32xf32, #tpu.memory_space<vmem>>, %arg13: memref<1x8x32xf32, #tpu.memory_space<vmem>>) attributes {dimension_semantics = [#tpu.dimension_semantics<parallel>], iteration_bounds = array<i64: 2>, scalar_prefetch = 0 : i64, scratch_operands = 0 : i64, tpu.core_type = #tpu.core_type<tc>, window_params = [{transform_indices = @transform_0, window_bounds = array<i64: 1, 8, 32>}, {pipeline_mode = #tpu.pipeline_mode<synchronous>, transform_indices = @transform_1, window_bounds = array<i64: 32, 96>}, {pipeline_mode = #tpu.pipeline_mode<synchronous>, transform_indices = @transform_2, window_bounds = array<i64: 32, 32>}, {pipeline_mode = #tpu.pipeline_mode<synchronous>, transform_indices = @transform_3, window_bounds = array<i64: 1, 32>}, {pipeline_mode = #tpu.pipeline_mode<synchronous>, transform_indices = @transform_4, window_bounds = array<i64: 1, 32>}, {pipeline_mode = #tpu.pipeline_mode<synchronous>, transform_indices = @transform_5, window_bounds = array<i64: 1, 32>}, {pipeline_mode = #tpu.pipeline_mode<synchronous>, transform_indices = @transform_6, window_bounds = array<i64: 1, 32>}, {pipeline_mode = #tpu.pipeline_mode<synchronous>, transform_indices = @transform_7, window_bounds = array<i64: 1, 32>}, {pipeline_mode = #tpu.pipeline_mode<synchronous>, transform_indices = @transform_8, window_bounds = array<i64: 32, 128>}, {pipeline_mode = #tpu.pipeline_mode<synchronous>, transform_indices = @transform_9, window_bounds = array<i64: 1, 128>}, {pipeline_mode = #tpu.pipeline_mode<synchronous>, transform_indices = @transform_10, window_bounds = array<i64: 128, 32>}, {pipeline_mode = #tpu.pipeline_mode<synchronous>, transform_indices = @transform_11, window_bounds = array<i64: 1, 32>}, {transform_indices = @transform_12, window_bounds = array<i64: 1, 8, 32>}]} {
    %c0 = arith.constant 0 : index
    %c0_0 = arith.constant 0 : index
    %c0_1 = arith.constant 0 : index
    %0 = vector.load %arg1[%c0, %c0_0, %c0_1] : memref<1x8x32xf32, #tpu.memory_space<vmem>>, vector<1x8x32xf32>
    %1 = vector.shape_cast %0 : vector<1x8x32xf32> to vector<8x32xf32>
    %c0_2 = arith.constant 0 : index
    %c0_3 = arith.constant 0 : index
    %2 = vector.load %arg5[%c0_2, %c0_3] : memref<1x32xf32, #tpu.memory_space<vmem>>, vector<1x32xf32>
    %3 = vector.shape_cast %2 : vector<1x32xf32> to vector<32xf32>
    %c0_4 = arith.constant 0 : index
    %c0_5 = arith.constant 0 : index
    %4 = vector.load %arg6[%c0_4, %c0_5] : memref<1x32xf32, #tpu.memory_space<vmem>>, vector<1x32xf32>
    %5 = vector.shape_cast %4 : vector<1x32xf32> to vector<32xf32>
    %cst = arith.constant dense<0.000000e+00> : vector<8xf32>
    %6 = vector.multi_reduction <add>, %1, %cst [1] : vector<8x32xf32> to vector<8xf32>
    %7 = vector.shape_cast %6 : vector<8xf32> to vector<8x1xf32>
    %cst_6 = arith.constant 3.200000e+01 : f32
    %8 = vector.broadcast %cst_6 : f32 to vector<8x1xf32>
    %9 = arith.divf %7, %8 : vector<8x1xf32>
    %10 = vector.broadcast %9 : vector<8x1xf32> to vector<8x32xf32>
    %11 = arith.subf %1, %10 : vector<8x32xf32>
    %12 = arith.mulf %11, %11 : vector<8x32xf32>
    %cst_7 = arith.constant dense<0.000000e+00> : vector<8xf32>
    %13 = vector.multi_reduction <add>, %12, %cst_7 [1] : vector<8x32xf32> to vector<8xf32>
    %14 = vector.shape_cast %13 : vector<8xf32> to vector<8x1xf32>
    %cst_8 = arith.constant 3.200000e+01 : f32
    %15 = vector.broadcast %cst_8 : f32 to vector<8x1xf32>
    %16 = arith.divf %14, %15 : vector<8x1xf32>
    %17 = vector.broadcast %9 : vector<8x1xf32> to vector<8x32xf32>
    %18 = arith.subf %1, %17 : vector<8x32xf32>
    %cst_9 = arith.constant 9.99999974E-6 : f32
    %19 = vector.broadcast %cst_9 : f32 to vector<8x1xf32>
    %20 = arith.addf %16, %19 : vector<8x1xf32>
    %21 = math.rsqrt %20 : vector<8x1xf32>
    %22 = vector.broadcast %21 : vector<8x1xf32> to vector<8x32xf32>
    %23 = arith.mulf %18, %22 : vector<8x32xf32>
    %24 = vector.shape_cast %3 : vector<32xf32> to vector<1x32xf32>
    %25 = vector.broadcast %24 : vector<1x32xf32> to vector<8x32xf32>
    %26 = arith.mulf %23, %25 : vector<8x32xf32>
    %27 = vector.shape_cast %5 : vector<32xf32> to vector<1x32xf32>
    %28 = vector.broadcast %27 : vector<1x32xf32> to vector<8x32xf32>
    %29 = arith.addf %26, %28 : vector<8x32xf32>
    %c0_10 = arith.constant 0 : index
    %c0_11 = arith.constant 0 : index
    %30 = vector.load %arg2[%c0_10, %c0_11] : memref<32x96xf32, #tpu.memory_space<vmem>>, vector<32x96xf32>
    %cst_12 = arith.constant dense<0.000000e+00> : vector<8x96xf32>
    %31 = tpu.matmul %29, %30, %cst_12 {dimension_numbers = #tpu.dot_dimension_numbers<[1], [0], [0], [1], [0, 0, 1, 1], [], []>} : vector<8x32xf32>, vector<32x96xf32>, vector<8x96xf32> -> vector<8x96xf32>
    %32 = tpu.iota {dimensions = array<i32: 0>} : vector<8x8xi32>
    %33 = tpu.iota {dimensions = array<i32: 1>} : vector<8x8xi32>
    %34 = arith.cmpi sle, %33, %32 : vector<8x8xi32>
    %35 = vector.extract_strided_slice %31 {offsets = [0, 0], sizes = [8, 8], strides = [1, 1]} : vector<8x96xf32> to vector<8x8xf32>
    %36 = vector.shape_cast %35 : vector<8x8xf32> to vector<1x8x8xf32>
    %37 = vector.extract_strided_slice %31 {offsets = [0, 32], sizes = [8, 8], strides = [1, 1]} : vector<8x96xf32> to vector<8x8xf32>
    %38 = vector.shape_cast %37 : vector<8x8xf32> to vector<1x8x8xf32>
    %39 = vector.extract_strided_slice %31 {offsets = [0, 64], sizes = [8, 8], strides = [1, 1]} : vector<8x96xf32> to vector<8x8xf32>
    %40 = vector.shape_cast %39 : vector<8x8xf32> to vector<1x8x8xf32>
    %cst_13 = arith.constant dense<0.000000e+00> : vector<1x8x8xf32>
    %41 = tpu.matmul %36, %38, %cst_13 {dimension_numbers = #tpu.dot_dimension_numbers<[2], [2], [1], [1], [0, 0, 0, 1, 1, 1], [0], [0]>} : vector<1x8x8xf32>, vector<1x8x8xf32>, vector<1x8x8xf32> -> vector<1x8x8xf32>
    %cst_14 = arith.constant -1.000000e+30 : f32
    %42 = vector.shape_cast %34 : vector<8x8xi1> to vector<1x8x8xi1>
    %43 = vector.broadcast %cst_14 : f32 to vector<1x8x8xf32>
    %44 = arith.select %42, %41, %43 : vector<1x8x8xi1>, vector<1x8x8xf32>
    %cst_15 = arith.constant dense<0xFF800000> : vector<1x8xf32>
    %45 = vector.multi_reduction <maximumf>, %44, %cst_15 [2] : vector<1x8x8xf32> to vector<1x8xf32>
    %46 = vector.shape_cast %45 : vector<1x8xf32> to vector<1x8x1xf32>
    %47 = vector.broadcast %46 : vector<1x8x1xf32> to vector<1x8x8xf32>
    %48 = arith.subf %44, %47 : vector<1x8x8xf32>
    %49 = math.exp %48 : vector<1x8x8xf32>
    %cst_16 = arith.constant dense<0.000000e+00> : vector<1x8xf32>
    %50 = vector.multi_reduction <add>, %49, %cst_16 [2] : vector<1x8x8xf32> to vector<1x8xf32>
    %51 = vector.shape_cast %50 : vector<1x8xf32> to vector<1x8x1xf32>
    %52 = tpu.reciprocal %51 : vector<1x8x1xf32> -> vector<1x8x1xf32>
    %53 = vector.broadcast %52 : vector<1x8x1xf32> to vector<1x8x8xf32>
    %54 = arith.mulf %49, %53 : vector<1x8x8xf32>
    %cst_17 = arith.constant dense<0.000000e+00> : vector<1x8x8xf32>
    %55 = tpu.matmul %54, %40, %cst_17 {dimension_numbers = #tpu.dot_dimension_numbers<[2], [1], [1], [2], [0, 0, 0, 1, 1, 2], [0], [0]>} : vector<1x8x8xf32>, vector<1x8x8xf32>, vector<1x8x8xf32> -> vector<1x8x8xf32>
    %56 = vector.shape_cast %55 : vector<1x8x8xf32> to vector<8x8xf32>
    %57 = vector.extract_strided_slice %31 {offsets = [0, 8], sizes = [8, 8], strides = [1, 1]} : vector<8x96xf32> to vector<8x8xf32>
    %58 = vector.shape_cast %57 : vector<8x8xf32> to vector<1x8x8xf32>
    %59 = vector.extract_strided_slice %31 {offsets = [0, 40], sizes = [8, 8], strides = [1, 1]} : vector<8x96xf32> to vector<8x8xf32>
    %60 = vector.shape_cast %59 : vector<8x8xf32> to vector<1x8x8xf32>
    %61 = vector.extract_strided_slice %31 {offsets = [0, 72], sizes = [8, 8], strides = [1, 1]} : vector<8x96xf32> to vector<8x8xf32>
    %62 = vector.shape_cast %61 : vector<8x8xf32> to vector<1x8x8xf32>
    %cst_18 = arith.constant dense<0.000000e+00> : vector<1x8x8xf32>
    %63 = tpu.matmul %58, %60, %cst_18 {dimension_numbers = #tpu.dot_dimension_numbers<[2], [2], [1], [1], [0, 0, 0, 1, 1, 1], [0], [0]>} : vector<1x8x8xf32>, vector<1x8x8xf32>, vector<1x8x8xf32> -> vector<1x8x8xf32>
    %cst_19 = arith.constant -1.000000e+30 : f32
    %64 = vector.shape_cast %34 : vector<8x8xi1> to vector<1x8x8xi1>
    %65 = vector.broadcast %cst_19 : f32 to vector<1x8x8xf32>
    %66 = arith.select %64, %63, %65 : vector<1x8x8xi1>, vector<1x8x8xf32>
    %cst_20 = arith.constant dense<0xFF800000> : vector<1x8xf32>
    %67 = vector.multi_reduction <maximumf>, %66, %cst_20 [2] : vector<1x8x8xf32> to vector<1x8xf32>
    %68 = vector.shape_cast %67 : vector<1x8xf32> to vector<1x8x1xf32>
    %69 = vector.broadcast %68 : vector<1x8x1xf32> to vector<1x8x8xf32>
    %70 = arith.subf %66, %69 : vector<1x8x8xf32>
    %71 = math.exp %70 : vector<1x8x8xf32>
    %cst_21 = arith.constant dense<0.000000e+00> : vector<1x8xf32>
    %72 = vector.multi_reduction <add>, %71, %cst_21 [2] : vector<1x8x8xf32> to vector<1x8xf32>
    %73 = vector.shape_cast %72 : vector<1x8xf32> to vector<1x8x1xf32>
    %74 = tpu.reciprocal %73 : vector<1x8x1xf32> -> vector<1x8x1xf32>
    %75 = vector.broadcast %74 : vector<1x8x1xf32> to vector<1x8x8xf32>
    %76 = arith.mulf %71, %75 : vector<1x8x8xf32>
    %cst_22 = arith.constant dense<0.000000e+00> : vector<1x8x8xf32>
    %77 = tpu.matmul %76, %62, %cst_22 {dimension_numbers = #tpu.dot_dimension_numbers<[2], [1], [1], [2], [0, 0, 0, 1, 1, 2], [0], [0]>} : vector<1x8x8xf32>, vector<1x8x8xf32>, vector<1x8x8xf32> -> vector<1x8x8xf32>
    %78 = vector.shape_cast %77 : vector<1x8x8xf32> to vector<8x8xf32>
    %79 = vector.extract_strided_slice %31 {offsets = [0, 16], sizes = [8, 8], strides = [1, 1]} : vector<8x96xf32> to vector<8x8xf32>
    %80 = vector.shape_cast %79 : vector<8x8xf32> to vector<1x8x8xf32>
    %81 = vector.extract_strided_slice %31 {offsets = [0, 48], sizes = [8, 8], strides = [1, 1]} : vector<8x96xf32> to vector<8x8xf32>
    %82 = vector.shape_cast %81 : vector<8x8xf32> to vector<1x8x8xf32>
    %83 = vector.extract_strided_slice %31 {offsets = [0, 80], sizes = [8, 8], strides = [1, 1]} : vector<8x96xf32> to vector<8x8xf32>
    %84 = vector.shape_cast %83 : vector<8x8xf32> to vector<1x8x8xf32>
    %cst_23 = arith.constant dense<0.000000e+00> : vector<1x8x8xf32>
    %85 = tpu.matmul %80, %82, %cst_23 {dimension_numbers = #tpu.dot_dimension_numbers<[2], [2], [1], [1], [0, 0, 0, 1, 1, 1], [0], [0]>} : vector<1x8x8xf32>, vector<1x8x8xf32>, vector<1x8x8xf32> -> vector<1x8x8xf32>
    %cst_24 = arith.constant -1.000000e+30 : f32
    %86 = vector.shape_cast %34 : vector<8x8xi1> to vector<1x8x8xi1>
    %87 = vector.broadcast %cst_24 : f32 to vector<1x8x8xf32>
    %88 = arith.select %86, %85, %87 : vector<1x8x8xi1>, vector<1x8x8xf32>
    %cst_25 = arith.constant dense<0xFF800000> : vector<1x8xf32>
    %89 = vector.multi_reduction <maximumf>, %88, %cst_25 [2] : vector<1x8x8xf32> to vector<1x8xf32>
    %90 = vector.shape_cast %89 : vector<1x8xf32> to vector<1x8x1xf32>
    %91 = vector.broadcast %90 : vector<1x8x1xf32> to vector<1x8x8xf32>
    %92 = arith.subf %88, %91 : vector<1x8x8xf32>
    %93 = math.exp %92 : vector<1x8x8xf32>
    %cst_26 = arith.constant dense<0.000000e+00> : vector<1x8xf32>
    %94 = vector.multi_reduction <add>, %93, %cst_26 [2] : vector<1x8x8xf32> to vector<1x8xf32>
    %95 = vector.shape_cast %94 : vector<1x8xf32> to vector<1x8x1xf32>
    %96 = tpu.reciprocal %95 : vector<1x8x1xf32> -> vector<1x8x1xf32>
    %97 = vector.broadcast %96 : vector<1x8x1xf32> to vector<1x8x8xf32>
    %98 = arith.mulf %93, %97 : vector<1x8x8xf32>
    %cst_27 = arith.constant dense<0.000000e+00> : vector<1x8x8xf32>
    %99 = tpu.matmul %98, %84, %cst_27 {dimension_numbers = #tpu.dot_dimension_numbers<[2], [1], [1], [2], [0, 0, 0, 1, 1, 2], [0], [0]>} : vector<1x8x8xf32>, vector<1x8x8xf32>, vector<1x8x8xf32> -> vector<1x8x8xf32>
    %100 = vector.shape_cast %99 : vector<1x8x8xf32> to vector<8x8xf32>
    %101 = vector.extract_strided_slice %31 {offsets = [0, 24], sizes = [8, 8], strides = [1, 1]} : vector<8x96xf32> to vector<8x8xf32>
    %102 = vector.shape_cast %101 : vector<8x8xf32> to vector<1x8x8xf32>
    %103 = vector.extract_strided_slice %31 {offsets = [0, 56], sizes = [8, 8], strides = [1, 1]} : vector<8x96xf32> to vector<8x8xf32>
    %104 = vector.shape_cast %103 : vector<8x8xf32> to vector<1x8x8xf32>
    %105 = vector.extract_strided_slice %31 {offsets = [0, 88], sizes = [8, 8], strides = [1, 1]} : vector<8x96xf32> to vector<8x8xf32>
    %106 = vector.shape_cast %105 : vector<8x8xf32> to vector<1x8x8xf32>
    %cst_28 = arith.constant dense<0.000000e+00> : vector<1x8x8xf32>
    %107 = tpu.matmul %102, %104, %cst_28 {dimension_numbers = #tpu.dot_dimension_numbers<[2], [2], [1], [1], [0, 0, 0, 1, 1, 1], [0], [0]>} : vector<1x8x8xf32>, vector<1x8x8xf32>, vector<1x8x8xf32> -> vector<1x8x8xf32>
    %cst_29 = arith.constant -1.000000e+30 : f32
    %108 = vector.shape_cast %34 : vector<8x8xi1> to vector<1x8x8xi1>
    %109 = vector.broadcast %cst_29 : f32 to vector<1x8x8xf32>
    %110 = arith.select %108, %107, %109 : vector<1x8x8xi1>, vector<1x8x8xf32>
    %cst_30 = arith.constant dense<0xFF800000> : vector<1x8xf32>
    %111 = vector.multi_reduction <maximumf>, %110, %cst_30 [2] : vector<1x8x8xf32> to vector<1x8xf32>
    %112 = vector.shape_cast %111 : vector<1x8xf32> to vector<1x8x1xf32>
    %113 = vector.broadcast %112 : vector<1x8x1xf32> to vector<1x8x8xf32>
    %114 = arith.subf %110, %113 : vector<1x8x8xf32>
    %115 = math.exp %114 : vector<1x8x8xf32>
    %cst_31 = arith.constant dense<0.000000e+00> : vector<1x8xf32>
    %116 = vector.multi_reduction <add>, %115, %cst_31 [2] : vector<1x8x8xf32> to vector<1x8xf32>
    %117 = vector.shape_cast %116 : vector<1x8xf32> to vector<1x8x1xf32>
    %118 = tpu.reciprocal %117 : vector<1x8x1xf32> -> vector<1x8x1xf32>
    %119 = vector.broadcast %118 : vector<1x8x1xf32> to vector<1x8x8xf32>
    %120 = arith.mulf %115, %119 : vector<1x8x8xf32>
    %cst_32 = arith.constant dense<0.000000e+00> : vector<1x8x8xf32>
    %121 = tpu.matmul %120, %106, %cst_32 {dimension_numbers = #tpu.dot_dimension_numbers<[2], [1], [1], [2], [0, 0, 0, 1, 1, 2], [0], [0]>} : vector<1x8x8xf32>, vector<1x8x8xf32>, vector<1x8x8xf32> -> vector<1x8x8xf32>
    %122 = vector.shape_cast %121 : vector<1x8x8xf32> to vector<8x8xf32>
    %123 = tpu.concatenate %56, %78, %100, %122 in 1 : vector<8x8xf32>, vector<8x8xf32>, vector<8x8xf32>, vector<8x8xf32> -> vector<8x32xf32>
    %c0_33 = arith.constant 0 : index
    %c0_34 = arith.constant 0 : index
    %124 = vector.load %arg3[%c0_33, %c0_34] : memref<32x32xf32, #tpu.memory_space<vmem>>, vector<32x32xf32>
    %cst_35 = arith.constant dense<0.000000e+00> : vector<8x32xf32>
    %125 = tpu.matmul %123, %124, %cst_35 {dimension_numbers = #tpu.dot_dimension_numbers<[1], [0], [0], [1], [0, 0, 1, 1], [], []>} : vector<8x32xf32>, vector<32x32xf32>, vector<8x32xf32> -> vector<8x32xf32>
    %126 = arith.addf %1, %125 : vector<8x32xf32>
    %c0_36 = arith.constant 0 : index
    %c0_37 = arith.constant 0 : index
    %127 = vector.load %arg4[%c0_36, %c0_37] : memref<1x32xf32, #tpu.memory_space<vmem>>, vector<1x32xf32>
    %128 = vector.shape_cast %127 : vector<1x32xf32> to vector<32xf32>
    %129 = vector.shape_cast %128 : vector<32xf32> to vector<1x32xf32>
    %130 = vector.broadcast %129 : vector<1x32xf32> to vector<8x32xf32>
    %131 = arith.addf %126, %130 : vector<8x32xf32>
    %c0_38 = arith.constant 0 : index
    %c0_39 = arith.constant 0 : index
    %132 = vector.load %arg7[%c0_38, %c0_39] : memref<1x32xf32, #tpu.memory_space<vmem>>, vector<1x32xf32>
    %133 = vector.shape_cast %132 : vector<1x32xf32> to vector<32xf32>
    %c0_40 = arith.constant 0 : index
    %c0_41 = arith.constant 0 : index
    %134 = vector.load %arg8[%c0_40, %c0_41] : memref<1x32xf32, #tpu.memory_space<vmem>>, vector<1x32xf32>
    %135 = vector.shape_cast %134 : vector<1x32xf32> to vector<32xf32>
    %cst_42 = arith.constant dense<0.000000e+00> : vector<8xf32>
    %136 = vector.multi_reduction <add>, %131, %cst_42 [1] : vector<8x32xf32> to vector<8xf32>
    %137 = vector.shape_cast %136 : vector<8xf32> to vector<8x1xf32>
    %cst_43 = arith.constant 3.200000e+01 : f32
    %138 = vector.broadcast %cst_43 : f32 to vector<8x1xf32>
    %139 = arith.divf %137, %138 : vector<8x1xf32>
    %140 = vector.broadcast %139 : vector<8x1xf32> to vector<8x32xf32>
    %141 = arith.subf %131, %140 : vector<8x32xf32>
    %142 = arith.mulf %141, %141 : vector<8x32xf32>
    %cst_44 = arith.constant dense<0.000000e+00> : vector<8xf32>
    %143 = vector.multi_reduction <add>, %142, %cst_44 [1] : vector<8x32xf32> to vector<8xf32>
    %144 = vector.shape_cast %143 : vector<8xf32> to vector<8x1xf32>
    %cst_45 = arith.constant 3.200000e+01 : f32
    %145 = vector.broadcast %cst_45 : f32 to vector<8x1xf32>
    %146 = arith.divf %144, %145 : vector<8x1xf32>
    %147 = vector.broadcast %139 : vector<8x1xf32> to vector<8x32xf32>
    %148 = arith.subf %131, %147 : vector<8x32xf32>
    %cst_46 = arith.constant 9.99999974E-6 : f32
    %149 = vector.broadcast %cst_46 : f32 to vector<8x1xf32>
    %150 = arith.addf %146, %149 : vector<8x1xf32>
    %151 = math.rsqrt %150 : vector<8x1xf32>
    %152 = vector.broadcast %151 : vector<8x1xf32> to vector<8x32xf32>
    %153 = arith.mulf %148, %152 : vector<8x32xf32>
    %154 = vector.shape_cast %133 : vector<32xf32> to vector<1x32xf32>
    %155 = vector.broadcast %154 : vector<1x32xf32> to vector<8x32xf32>
    %156 = arith.mulf %153, %155 : vector<8x32xf32>
    %157 = vector.shape_cast %135 : vector<32xf32> to vector<1x32xf32>
    %158 = vector.broadcast %157 : vector<1x32xf32> to vector<8x32xf32>
    %159 = arith.addf %156, %158 : vector<8x32xf32>
    %c0_47 = arith.constant 0 : index
    %c0_48 = arith.constant 0 : index
    %160 = vector.load %arg9[%c0_47, %c0_48] : memref<32x128xf32, #tpu.memory_space<vmem>>, vector<32x128xf32>
    %cst_49 = arith.constant dense<0.000000e+00> : vector<8x128xf32>
    %161 = tpu.matmul %159, %160, %cst_49 {dimension_numbers = #tpu.dot_dimension_numbers<[1], [0], [0], [1], [0, 0, 1, 1], [], []>} : vector<8x32xf32>, vector<32x128xf32>, vector<8x128xf32> -> vector<8x128xf32>
    %c0_50 = arith.constant 0 : index
    %c0_51 = arith.constant 0 : index
    %162 = vector.load %arg10[%c0_50, %c0_51] : memref<1x128xf32, #tpu.memory_space<vmem>>, vector<1x128xf32>
    %163 = vector.shape_cast %162 : vector<1x128xf32> to vector<128xf32>
    %164 = vector.shape_cast %163 : vector<128xf32> to vector<1x128xf32>
    %165 = vector.broadcast %164 : vector<1x128xf32> to vector<8x128xf32>
    %166 = arith.addf %161, %165 : vector<8x128xf32>
    %cst_52 = arith.constant 0.000000e+00 : f32
    %167 = vector.broadcast %cst_52 : f32 to vector<8x128xf32>
    %168 = arith.maximumf %166, %167 : vector<8x128xf32>
    %c0_53 = arith.constant 0 : index
    %c0_54 = arith.constant 0 : index
    %169 = vector.load %arg11[%c0_53, %c0_54] : memref<128x32xf32, #tpu.memory_space<vmem>>, vector<128x32xf32>
    %cst_55 = arith.constant dense<0.000000e+00> : vector<8x32xf32>
    %170 = tpu.matmul %168, %169, %cst_55 {dimension_numbers = #tpu.dot_dimension_numbers<[1], [0], [0], [1], [0, 0, 1, 1], [], []>} : vector<8x128xf32>, vector<128x32xf32>, vector<8x32xf32> -> vector<8x32xf32>
    %c0_56 = arith.constant 0 : index
    %c0_57 = arith.constant 0 : index
    %171 = vector.load %arg12[%c0_56, %c0_57] : memref<1x32xf32, #tpu.memory_space<vmem>>, vector<1x32xf32>
    %172 = vector.shape_cast %171 : vector<1x32xf32> to vector<32xf32>
    %173 = vector.shape_cast %172 : vector<32xf32> to vector<1x32xf32>
    %174 = vector.broadcast %173 : vector<1x32xf32> to vector<8x32xf32>
    %175 = arith.addf %170, %174 : vector<8x32xf32>
    %176 = arith.addf %131, %175 : vector<8x32xf32>
    %177 = vector.shape_cast %176 : vector<8x32xf32> to vector<1x8x32xf32>
    %c0_58 = arith.constant 0 : index
    %c0_59 = arith.constant 0 : index
    %c0_60 = arith.constant 0 : index
    %178 = vector.load %arg13[%c0_58, %c0_59, %c0_60] : memref<1x8x32xf32, #tpu.memory_space<vmem>>, vector<1x8x32xf32>
    tpu.vector_store %arg13[%c0_58, %c0_59, %c0_60], %177 {strides = array<i32>} : memref<1x8x32xf32, #tpu.memory_space<vmem>>, vector<1x8x32xf32>,
    return
  }
  func.func @transform_0(%arg0: i32) -> (i32, i32, i32) {
    %c0_i32 = arith.constant 0 : i32
    %c0_i32_0 = arith.constant 0 : i32
    %c0_i32_1 = arith.constant 0 : i32
    return %arg0, %c0_i32, %c0_i32_0 : i32, i32, i32
  }
  func.func @transform_1(%arg0: i32) -> (i32, i32) {
    %c0_i32 = arith.constant 0 : i32
    %c0_i32_0 = arith.constant 0 : i32
    %c0_i32_1 = arith.constant 0 : i32
    return %c0_i32, %c0_i32_0 : i32, i32
  }
  func.func @transform_2(%arg0: i32) -> (i32, i32) {
    %c0_i32 = arith.constant 0 : i32
    %c0_i32_0 = arith.constant 0 : i32
    %c0_i32_1 = arith.constant 0 : i32
    return %c0_i32, %c0_i32_0 : i32, i32
  }
  func.func @transform_3(%arg0: i32) -> (i32, i32) {
    %c0_i32 = arith.constant 0 : i32
    %c0_i32_0 = arith.constant 0 : i32
    %c0_i32_1 = arith.constant 0 : i32
    return %c0_i32, %c0_i32_0 : i32, i32
  }
  func.func @transform_4(%arg0: i32) -> (i32, i32) {
    %c0_i32 = arith.constant 0 : i32
    %c0_i32_0 = arith.constant 0 : i32
    %c0_i32_1 = arith.constant 0 : i32
    return %c0_i32, %c0_i32_0 : i32, i32
  }
  func.func @transform_5(%arg0: i32) -> (i32, i32) {
    %c0_i32 = arith.constant 0 : i32
    %c0_i32_0 = arith.constant 0 : i32
    %c0_i32_1 = arith.constant 0 : i32
    return %c0_i32, %c0_i32_0 : i32, i32
  }
  func.func @transform_6(%arg0: i32) -> (i32, i32) {
    %c0_i32 = arith.constant 0 : i32
    %c0_i32_0 = arith.constant 0 : i32
    %c0_i32_1 = arith.constant 0 : i32
    return %c0_i32, %c0_i32_0 : i32, i32
  }
  func.func @transform_7(%arg0: i32) -> (i32, i32) {
    %c0_i32 = arith.constant 0 : i32
    %c0_i32_0 = arith.constant 0 : i32
    %c0_i32_1 = arith.constant 0 : i32
    return %c0_i32, %c0_i32_0 : i32, i32
  }
  func.func @transform_8(%arg0: i32) -> (i32, i32) {
    %c0_i32 = arith.constant 0 : i32
    %c0_i32_0 = arith.constant 0 : i32
    %c0_i32_1 = arith.constant 0 : i32
    return %c0_i32, %c0_i32_0 : i32, i32
  }
  func.func @transform_9(%arg0: i32) -> (i32, i32) {
    %c0_i32 = arith.constant 0 : i32
    %c0_i32_0 = arith.constant 0 : i32
    %c0_i32_1 = arith.constant 0 : i32
    return %c0_i32, %c0_i32_0 : i32, i32
  }
  func.func @transform_10(%arg0: i32) -> (i32, i32) {
    %c0_i32 = arith.constant 0 : i32
    %c0_i32_0 = arith.constant 0 : i32
    %c0_i32_1 = arith.constant 0 : i32
    return %c0_i32, %c0_i32_0 : i32, i32
  }
  func.func @transform_11(%arg0: i32) -> (i32, i32) {
    %c0_i32 = arith.constant 0 : i32
    %c0_i32_0 = arith.constant 0 : i32
    %c0_i32_1 = arith.constant 0 : i32
    return %c0_i32, %c0_i32_0 : i32, i32
  }
  func.func @transform_12(%arg0: i32) -> (i32, i32, i32) {
    %c0_i32 = arith.constant 0 : i32
    %c0_i32_0 = arith.constant 0 : i32
    %c0_i32_1 = arith.constant 0 : i32
    return %arg0, %c0_i32, %c0_i32_0 : i32, i32, i32
  }
}

</mosaic_0001>

<bundles_post_ra>
// kernel: tpu_custom_call.1
= control target key start
LH: loop header
LB: loop body
LE: loop exit
PB: predicated region body
PF: predicated region fallthrough
CT: control target
= control target key end

     0   :  { %s1548_s0 = inlined_call_operand.vmem [shape: f32[2,8,32], index: 0, kind: input, shape index: {}]   ;;  %s1549_s1 = inlined_call_operand.vmem [shape: f32[32,96], index: 1, kind: input, shape index: {}]   ;;  %s1550_s2 = inlined_call_operand.vmem [shape: f32[32,32], index: 2, kind: input, shape index: {}]   ;;  %s1551_s3 = inlined_call_operand.vmem [shape: f32[1,32], index: 3, kind: input, shape index: {}]   ;;  %s1552_s4 = inlined_call_operand.vmem [shape: f32[1,32], index: 4, kind: input, shape index: {}]   ;;  %s1553_s5 = inlined_call_operand.vmem [shape: f32[1,32], index: 5, kind: input, shape index: {}]   ;;  %s1554_s6 = inlined_call_operand.vmem [shape: f32[1,32], index: 6, kind: input, shape index: {}]   ;;  %s1555_s7 = inlined_call_operand.vmem [shape: f32[1,32], index: 7, kind: input, shape index: {}]   ;;  %s1556_s8 = inlined_call_operand.vmem [shape: f32[32,128], index: 8, kind: input, shape index: {}]   ;;  %s1557_s9 = inlined_call_operand.vmem [shape: f32[1,128], index: 9, kind: input, shape index: {}]   ;;  %s1558_s10 = inlined_call_operand.vmem [shape: f32[128,32], index: 10, kind: input, shape index: {}]   ;;  %s1559_s11 = inlined_call_operand.vmem [shape: f32[1,32], index: 11, kind: input, shape index: {}]   ;;  %s1560_s12 = inlined_call_operand.hbm [shape: f32[2,8,32], index: 12, kind: output, shape index: {}]  }
   0x1   :  { %1561 = sst [smem:[#allocation5_spill]] %s1548_s0 }
   0x2   :  { %1562 = sst [smem:[#allocation6_spill]] %s1549_s1 }
   0x3   :  { %1563 = sst [smem:[#allocation7_spill]] %s1550_s2 }
   0x4   :  { %17 = vsyncpa [#allocation3], 0 }
   0x5   :  { %19 = vsyncpa [#allocation3 + $0x1], 0  ;;  %s1281_s21 = smov 0   ;;  %s1283_s22 = smov 0  }
   0x6   :  { %s1285_s23 = smov 0   ;;  %s1287_s24 = smov 0  }
   0x7 LB: > { %s1302_s25 = sadd.s32 4294967295, %s1199_s24   ;;  %s1029_s26 = sadd.s32 4294967294, %s1199_s24   ;;  %s1199_s24 = sphi %s1287_s24, %s1574_s24   ;;  %s1195_s23 = sphi %s1285_s23, %s1573_s23   ;;  %s1191_s22 = sphi %s1283_s22, %s1572_s22   ;;  %s1187_s21 = sphi %s1281_s21, %s1571_s21  }
   0x8   : > { %s1306_s27 = sadd.s32 1, %s1199_s24   ;;  %s289_s28 = sadd.s32 1, %s1195_s23 }
   0x9   : > { %s286_s29 = ssub.s32 %s1199_s24, %s1306_s27  ;;  %p299_p0 = scmp.ne.s32.totalorder %s1195_s23, %s1191_s22 }
   0xa   : > { %p287_p1 = scmp.eq.s32.totalorder %s286_s29, 0  ;;  %p300_p2 = scmp.eq.s32.totalorder %s1302_s25, 1 }
   0xb   : > { %p305_p3 = scmp.ne.s32.totalorder %s1191_s22, %s1187_s21  ;;  %p306_p4 = scmp.eq.s32.totalorder %s1029_s26, 1 }
   0xc   : > { %s1317_s30 = scalar_select %p287_p1, %s1195_s23, %s289_s28  }
   0xd   : > { %p1319_p5 = por %p300_p2, %p299_p0  ;;  %p1323_p6 = por %p306_p4, %p305_p3 }
   0xe   : > { %p1032_p7 = scmp.ge.s32.totalorder %s1199_s24, 1  ;;  %p364_p8 = scmp.lt.s32.totalorder %s1199_s24, 3 }
  0x10   : > { %p365_p9 = pnand %p1032_p7, %p364_p8 }
  0x11   : > { %p405_p10 = scmp.lt.s32.totalorder (!%p365_p9), %s1302_s25, 1  ;;  %s1566_s0 = sld [smem:[#allocation5_spill]] (!%p365_p9) }
  0x12   : > { %368 = sbr.rel (%p365_p9) target bundleno = 1877 (0x755), region = 68  ;;  %s1567_s1 = sld [smem:[#allocation6_spill]] (!%p365_p9) }
  0x13   : > { %s1202_s29 = smov (!%p365_p9), 112   ;;  %s1205_s17 = smov (!%p365_p9), 80  }
  0x14   : > { %s1206_s18 = smov (!%p365_p9), 88   ;;  %s1208_s20 = smov (!%p365_p9), 72  }
  0x15   : > { %s1209_s26 = smov (!%p365_p9), 64   ;;  %s1210_s28 = smov (!%p365_p9), 56  }
  0x16   : > { %s1570_s2 = sld [smem:[#allocation7_spill]] (!%p365_p9) }
  0x17   : > { %s406_s15 = scalar_select %p405_p10, %s1302_s25, 1  ;;  %vm412_vm0 = vcmask 261120   ;;  %v1201_v2 = vmov 32.0   ;;  %v1108_v27 = vld [vmem:[%s1552_s4] ss:$0 sm:$0xff]  ;;  %vm485_vm5 = vcmask 64512   ;;  %v477_v41 = vlaneseq }
  0x18   : > { %1115 = vrcp.f32 %v1201_v2  ;;  %v453_v14 = vld [vmem:[%s1567_s1 + $0x18] sm:$0xff]  ;;  %v452_v15 = vld [vmem:[%s1567_s1 + $0x10] sm:$0xff]  ;;  %v451_v16 = vld [vmem:[%s1567_s1 + $0x8] sm:$0xff] }
  0x19   : > { %s1034_s16 = sshll.u32 %s406_s15, 3  ;;  %469 = vmatpush.msra.mxu2 %v453_v14  ;;  %v450_v17 = vld [vmem:[%s1567_s1] sm:$0xff]  ;;  %s1203_s15 = smov 120   ;;  %v478_v42 = vshrl.u32 %v477_v41, 7  ;;  %v480_v43 = vand.u32 127, %v477_v41 }
  0x1a   : > { %s408_s19 = scalar_lea.vmem %s1566_s0, %s1034_s16  ;;  %v1109_v30 = vld [vmem:[%s1553_s5] ss:$0 sm:$0xff]  ;;  %s1204_s16 = smov 96  }
  0x1b   : > { %v1334_v0 = vld [vmem:[%s408_s19] sm:$0xff]  ;;  %470 = vmatpush.msra.mxu2 %v452_v15  ;;  %s1207_s19 = smov 104   ;;  %vm481_vm6 = vcmp.le.s32.totalorder %v480_v43, %v478_v42 }
  0x1c   : > { %v413_v1 = vsel %vm412_vm0, %v1334_v0, 0.0 }
  0x1d   : > { %414 = vadd.xlane.f32.xlu0 %v413_v1  ;;  %471 = vmatpush.msra.mxu2 %v451_v16 }
  0x1e   : > { %v1116_v3 = vpop.eup %1115 }
  0x1f   : > { %v417_v4 = vmul.f32 32.0, %v1116_v3  ;;  %vm421_vm1 = vweird.f32 %v1116_v3  ;;  %472 = vmatpush.msra.mxu2 %v450_v17 }
  0x21   : > { %v418_v5 = vsub.f32 1.0, %v417_v4 }
  0x23   : > { %v419_v6 = vmul.f32 %v1116_v3, %v418_v5 }
  0x25   : > { %v420_v7 = vadd.f32 %v1116_v3, %v419_v6 }
  0x27   : > { %v1338_v8 = vsel %vm421_vm1, %v1116_v3, %v420_v7 }
  0x90   : > { %v415_v9 = vpop.xlane.xlu0 %414 }
  0x91   : > { %v423_v10 = vmul.f32 %v1338_v8, %v415_v9 }
  0x93   : > { %v424_v11 = vsub.f32 %v1334_v0, %v423_v10 }
  0x95   : > { %v425_v12 = vmul.f32 %v424_v11, %v424_v11 }
  0x97   : > { %v426_v13 = vsel %vm412_vm0, %v425_v12, 0.0 }
  0x98   : > { %427 = vadd.xlane.f32.xlu0 %v426_v13 }
 0x10b   : > { %v428_v18 = vpop.xlane.xlu0 %427 }
 0x10c   : > { %v429_v19 = vmul.f32 %v428_v18, %v1338_v8 }
 0x10e   : > { %v430_v20 = vadd.f32 1e-05, %v429_v19 }
 0x110   : > { %1117 = vrsqrt.f32 %v430_v20  ;;  %vm437_vm3 = vweird.f32 %v430_v20 }
 0x116   : > { %v1118_v21 = vpop.eup %1117 }
 0x117   : > { %v432_v22 = vmul.f32 %v1118_v21, %v430_v20  ;;  %vm438_vm2 = vweird.f32 %v1118_v21 }
 0x118   : > { %vm439_vm4 = vmor %vm437_vm3, %vm438_vm2 }
 0x119   : > { %v433_v23 = vmul.f32 %v1118_v21, %v432_v22 }
 0x11b   : > { %v434_v24 = vmul.f32 0.5, %v433_v23 }
 0x11d   : > { %v435_v25 = vsub.f32 1.5, %v434_v24 }
 0x11f   : > { %v436_v26 = vmul.f32 %v1118_v21, %v435_v25 }
 0x121   : > { %v440_v28 = vsel %vm439_vm4, %v1118_v21, %v436_v26 }
 0x122   : > { %v441_v29 = vmul.f32 %v440_v28, %v424_v11 }
 0x124   : > { %v445_v31 = vmul.f32 %v1108_v27, %v441_v29 }
 0x126   : > { %v449_v32 = vadd.f32 %v1109_v30, %v445_v31 }
 0x128   : > { %1035 = vmatmul.msk.f32.vlgmr.msra.gmra.mxu2 %vm412_vm0, %v449_v32 }
 0x1ab   : > { %v1363_v33 = vpop.f32.mrf.mxu2 }
 0x1ac   : > { %640 = vrot.lane.b32.xlu0 %v1363_v33, %s1202_s29  ;;  %561 = vrot.lane.b32.xlu2 %v1363_v33, %s1203_s15  ;;  %s1211_s29 = smov 40   ;;  %s1212_s15 = smov 48  }
 0x1ad   : > { %483 = vrot.lane.b32.xlu1 %v1363_v33, %s1204_s16  ;;  %s1213_s16 = smov 8  }
 0x1b4   : > { %642 = vrot.lane.b32.xlu2 %v1363_v33, %s1205_s17  ;;  %s1214_s17 = smov 24  }
 0x1b5   : > { %563 = vrot.lane.b32.xlu1 %v1363_v33, %s1206_s18  ;;  %s1215_s18 = smov 16  }
 0x1bc   : > { %719 = vrot.lane.b32.xlu2 %v1363_v33, %s1207_s19 }
 0x1bd   : > { %721 = vrot.lane.b32.xlu1 %v1363_v33, %s1208_s20 }
 0x206   : > { %v562_v34 = vpop.permute.xlu2 %561 }
 0x20e   : > { %v643_v36 = vpop.permute.xlu2 %642 }
 0x216   : > { %v720_v40 = vpop.permute.xlu2 %719 }
 0x21e   : > { %v641_v38 = vpop.permute.xlu0 %640 }
 0x21f   : > { %v484_v35 = vpop.permute.xlu1 %483 }
 0x220   : > { %1036 = vmatpush.xpose.msk.msra.mxu1 %vm485_vm5, %v484_v35 }
 0x223   : > { %1037 = vmatmul.msk.f32.vlgmr.msra.gmra.mxu1 %vm485_vm5, %v1363_v33 }
 0x224   : > { %1042 = vmatpush.xpose.msk.msrb.mxu1 %vm485_vm5, %v643_v36 }
 0x227   : > { %v564_v37 = vpop.permute.xlu1 %563 }
 0x228   : > { %1039 = vmatpush.xpose.msk.msra.mxu3 %vm485_vm5, %v564_v37 }
 0x22b   : > { %1040 = vmatmul.msk.f32.vlgmr.msra.gmra.mxu3 %vm485_vm5, %v562_v34  ;;  %1043 = vmatmul.msk.f32.vlgmr.msrb.gmra.mxu1 %vm485_vm5, %v641_v38 }
 0x22f   : > { %v722_v39 = vpop.permute.xlu1 %721 }
 0x230   : > { %1045 = vmatpush.xpose.msk.msra.mxu1 %vm485_vm5, %v722_v39 }
 0x233   : > { %1046 = vmatmul.msk.f32.vlgmr.msra.gmra.mxu1 %vm485_vm5, %v720_v40 }
 0x2a0   : > { %v507_v44 = vpop.f32.mrf.mxu1 }
 0x2a1   : > { %v510_v45 = vsel %vm481_vm6, %v507_v44, -1e+30 }
 0x2a2   : > { %v511_v46 = vsel %vm485_vm5, %v510_v45, -inf }
 0x2a3   : > { %512 = vmax.xlane.f32.xlu1 %v511_v46 }
 0x2a8   : > { %v665_v47 = vpop.f32.mrf.mxu1 }
 0x2a9   : > { %v668_v48 = vsel %vm481_vm6, %v665_v47, -1e+30 }
 0x2aa   : > { %v669_v49 = vsel %vm485_vm5, %v668_v48, -inf }
 0x2ab   : > { %670 = vmax.xlane.f32.xlu0 %v669_v49 }
 0x2ae   : > { %v586_v50 = vpop.f32.mrf.mxu3 }
 0x2af   : > { %v589_v51 = vsel %vm481_vm6, %v586_v50, -1e+30 }
 0x2b0   : > { %v590_v52 = vsel %vm485_vm5, %v589_v51, -inf  ;;  %v744_v53 = vpop.f32.mrf.mxu1 }
 0x2b1   : > { %591 = vmax.xlane.f32.xlu2 %v590_v52  ;;  %v747_v54 = vsel %vm481_vm6, %v744_v53, -1e+30  ;;  %v1111_v53 = vld [vmem:[%s1554_s6] ss:$0 sm:$0xff] }
 0x2b2   : > { %v748_v55 = vsel %vm485_vm5, %v747_v54, -inf }
 0x2b9   : > { %749 = vmax.xlane.f32.xlu2 %v748_v55 }
 0x2d1   : > { %535 = vrot.lane.b32.xlu2 %v1363_v33, %s1209_s26 }
 0x316   : > { %v513_v56 = vpop.xlane.xlu1 %512 }
 0x317   : > { %v514_v57 = vsub.f32 %v510_v45, %v513_v56 }
 0x319   : > { %v515_v58 = vmul.f32 1.442695, %v514_v57 }
 0x31b   : > { %1119 = vpow2.f32 %v515_v58 }
 0x31e   : > { %v671_v59 = vpop.xlane.xlu0 %670 }
 0x31f   : > { %v672_v60 = vsub.f32 %v668_v48, %v671_v59 }
 0x321   : > { %v1120_v61 = vpop.eup %1119  ;;  %v673_v62 = vmul.f32 1.442695, %v672_v60 }
 0x322   : > { %v517_v63 = vsel %vm485_vm5, %v1120_v61, 0.0 }
 0x323   : > { %1121 = vpow2.f32 %v673_v62  ;;  %518 = vadd.xlane.f32.xlu1 %v517_v63 }
 0x324   : > { %v592_v1 = vpop.xlane.xlu2 %591 }
 0x325   : > { %v593_v2 = vsub.f32 %v589_v51, %v592_v1 }
 0x327   : > { %v594_v3 = vmul.f32 1.442695, %v593_v2 }
 0x329   : > { %v1387_v4 = vpop.eup %1121  ;;  %1123 = vpow2.f32 %v594_v3 }
 0x32a   : > { %v675_v5 = vsel %vm485_vm5, %v1387_v4, 0.0 }
 0x32b   : > { %676 = vadd.xlane.f32.xlu1 %v675_v5 }
 0x32c   : > { %v750_v6 = vpop.xlane.xlu2 %749 }
 0x32d   : > { %v751_v7 = vsub.f32 %v747_v54, %v750_v6 }
 0x32f   : > { %v1391_v9 = vpop.eup %1123  ;;  %v752_v10 = vmul.f32 1.442695, %v751_v7 }
 0x330   : > { %v596_v11 = vsel %vm485_vm5, %v1391_v9, 0.0 }
 0x331   : > { %1125 = vpow2.f32 %v752_v10  ;;  %597 = vadd.xlane.f32.xlu2 %v596_v11  ;;  %v818_v10 = vld [vmem:[%s1570_s2 + $0x18] sm:$0xff]  ;;  %v816_v11 = vld [vmem:[%s1570_s2 + $0x8] sm:$0xff] }
 0x332   : > { %834 = vmatpush.msrb.mxu1 %v818_v10 }
 0x334   : > { %v536_v12 = vpop.permute.xlu2 %535 }
 0x335   : > { %556 = vmatpush.msrb.mxu2 %v536_v12  ;;  %v815_v12 = vld [vmem:[%s1570_s2] sm:$0xff] }
 0x337   : > { %v1395_v13 = vpop.eup %1125 }
 0x338   : > { %v754_v14 = vsel %vm485_vm5, %v1395_v13, 0.0 }
 0x339   : > { %755 = vadd.xlane.f32.xlu0 %v754_v14 }
 0x344   : > { %614 = vrot.lane.b32.xlu1 %v1363_v33, %s1210_s28 }
 0x349   : > { %772 = vrot.lane.b32.xlu2 %v1363_v33, %s1211_s29 }
 0x34d   : > { %693 = vrot.lane.b32.xlu0 %v1363_v33, %s1212_s15  ;;  %s402_s15 = sand.u32 1, %s1191_s22  }
 0x396   : > { %v519_v15 = vpop.xlane.xlu1 %518 }
 0x397   : > { %1127 = vrcp.f32 %v519_v15  ;;  %v531_v20 = vand.u32 2147483648, %v519_v15  ;;  %v529_v22 = vand.u32 2147483647, %v519_v15  ;;  %vm525_vm8 = vweird.f32 %v519_v15 }
 0x399   : > { %v532_v25 = vor.u32 1.1754944e-38, %v531_v20  ;;  %vm530_vm10 = vcmp.eq.f32.partialorder %v529_v22, 8.507059e+37 }
 0x39d   : > { %v1128_v16 = vpop.eup %1127 }
 0x39e   : > { %v521_v17 = vmul.f32 %v1128_v16, %v519_v15  ;;  %v677_v18 = vpop.xlane.xlu1 %676  ;;  %vm526_vm7 = vweird.f32 %v1128_v16 }
 0x39f   : > { %1129 = vrcp.f32 %v677_v18  ;;  %vm527_vm9 = vmor %vm525_vm8, %vm526_vm7  ;;  %v689_v47 = vand.u32 2147483648, %v677_v18  ;;  %vm683_vm1 = vweird.f32 %v677_v18  ;;  %v687_v51 = vand.u32 2147483647, %v677_v18 }
 0x3a0   : > { %v522_v19 = vsub.f32 1.0, %v521_v17 }
 0x3a1   : > { %v690_v58 = vor.u32 1.1754944e-38, %v689_v47  ;;  %vm688_vm6 = vcmp.eq.f32.partialorder %v687_v51, 8.507059e+37  ;;  %v917_v47 = vld [vmem:[%s1558_s10 + $0x28] sm:$0xff]  ;;  %v915_v51 = vld [vmem:[%s1558_s10 + $0x18] sm:$0xff] }
 0x3a2   : > { %v523_v21 = vmul.f32 %v1128_v16, %v522_v19  ;;  %v1110_v19 = vld [vmem:[%s1551_s3] ss:$0 sm:$0xff] }
 0x3a4   : > { %v524_v23 = vadd.f32 %v1128_v16, %v523_v21  ;;  %v598_v24 = vpop.xlane.xlu2 %597 }
 0x3a5   : > { %1131 = vrcp.f32 %v598_v24  ;;  %v1130_v26 = vpop.eup %1129  ;;  %v610_v36 = vand.u32 2147483648, %v598_v24  ;;  %v608_v38 = vand.u32 2147483647, %v598_v24  ;;  %vm604_vm12 = vweird.f32 %v598_v24 }
 0x3a6   : > { %v528_v27 = vsel %vm527_vm9, %v1128_v16, %v524_v23  ;;  %v679_v30 = vmul.f32 %v1130_v26, %v677_v18  ;;  %vm684_vm15 = vweird.f32 %v1130_v26  ;;  %vm811_vm9 = vcmask 130048  }
 0x3a7   : > { %v533_v28 = vsel %vm530_vm10, %v532_v25, %v528_v27  ;;  %v611_v42 = vor.u32 1.1754944e-38, %v610_v36  ;;  %vm609_vm14 = vcmp.eq.f32.partialorder %v608_v38, 8.507059e+37  ;;  %vm1404_vm2 = vmor %vm683_vm1, %vm684_vm15  ;;  %vm813_vm10 = vcmask 195584  }
 0x3a8   : > { %v534_v29 = vmul.f32 %v1120_v61, %v533_v28  ;;  %v680_v34 = vsub.f32 1.0, %v679_v30  ;;  %v881_v30 = vld [vmem:[%s1556_s8 + $0x8] sm:$0xff] }
 0x3aa   : > { %1038 = vmatmul.msk.f32.vlgmr.msrb.gmra.mxu2 %vm485_vm5, %v534_v29  ;;  %v681_v39 = vmul.f32 %v1130_v26, %v680_v34  ;;  %v883_v29 = vld [vmem:[%s1556_s8 + $0x18] sm:$0xff]  ;;  %v925_v34 = vld [vmem:[%s1558_s10 + $0x68] sm:$0xff] }
 0x3ab   : > { %v1132_v31 = vpop.eup %1131 }
 0x3ac   : > { %v600_v32 = vmul.f32 %v1132_v31, %v598_v24  ;;  %v756_v33 = vpop.xlane.xlu0 %755  ;;  %vm605_vm11 = vweird.f32 %v1132_v31  ;;  %v682_v45 = vadd.f32 %v1130_v26, %v681_v39  ;;  %v773_v56 = vpop.permute.xlu2 %772  ;;  %v923_v39 = vld [vmem:[%s1558_s10 + $0x58] sm:$0xff] }
 0x3ad   : > { %1133 = vrcp.f32 %v756_v33  ;;  %vm606_vm13 = vmor %vm604_vm12, %vm605_vm11  ;;  %v768_v52 = vand.u32 2147483648, %v756_v33  ;;  %v766_v55 = vand.u32 2147483647, %v756_v33  ;;  %vm762_vm4 = vweird.f32 %v756_v33 }
 0x3ae   : > { %v601_v35 = vsub.f32 1.0, %v600_v32  ;;  %v686_v57 = vsel %vm1404_vm2, %v1130_v26, %v682_v45  ;;  %v927_v32 = vld [vmem:[%s1558_s10 + $0x78] sm:$0xff]  ;;  %v918_v45 = vld [vmem:[%s1558_s10 + $0x30] sm:$0xff] }
 0x3af   : > { %v769_v60 = vor.u32 1.1754944e-38, %v768_v52  ;;  %vm767_vm8 = vcmp.eq.f32.partialorder %v766_v55, 8.507059e+37  ;;  %v691_v62 = vsel %vm688_vm6, %v690_v58, %v686_v57  ;;  %932 = vmatpush.msra.mxu0 %v927_v32 }
 0x3b0   : > { %v602_v37 = vmul.f32 %v1132_v31, %v601_v35  ;;  %v692_v3 = vmul.f32 %v1387_v4, %v691_v62  ;;  %v817_v4 = vld [vmem:[%s1570_s2 + $0x10] sm:$0xff]  ;;  %v1113_v62 = vld [vmem:[%s1557_s9] ss:$0 sm:$0xff] }
 0x3b1   : > { %835 = vmatpush.msrb.mxu1 %v817_v4 }
 0x3b2   : > { %v603_v40 = vadd.f32 %v1132_v31, %v602_v37  ;;  %v924_v37 = vld [vmem:[%s1558_s10 + $0x60] sm:$0xff] }
 0x3b3   : > { %v1134_v41 = vpop.eup %1133  ;;  %836 = vmatpush.msrb.mxu1 %v816_v11 }
 0x3b4   : > { %v607_v43 = vsel %vm606_vm13, %v1132_v31, %v603_v40  ;;  %v758_v44 = vmul.f32 %v1134_v41, %v756_v33  ;;  %vm763_vm3 = vweird.f32 %v1134_v41  ;;  %v880_v31 = vld [vmem:[%s1556_s8] sm:$0xff]  ;;  %v926_v33 = vld [vmem:[%s1558_s10 + $0x70] sm:$0xff] }
 0x3b5   : > { %v612_v46 = vsel %vm609_vm14, %v611_v42, %v607_v43  ;;  %vm764_vm7 = vmor %vm762_vm4, %vm763_vm3  ;;  %837 = vmatpush.msrb.mxu1 %v815_v12  ;;  %933 = vmatpush.msra.mxu0 %v926_v33  ;;  %v922_v40 = vld [vmem:[%s1558_s10 + $0x50] sm:$0xff]  ;;  %v919_v43 = vld [vmem:[%s1558_s10 + $0x38] sm:$0xff] }
 0x3b6   : > { %v759_v48 = vsub.f32 1.0, %v758_v44  ;;  %v615_v49 = vpop.permute.xlu1 %614  ;;  %v613_v50 = vmul.f32 %v1391_v9, %v612_v46 }
 0x3b7   : > { %635 = vmatpush.msra.mxu2 %v615_v49  ;;  %934 = vmatpush.msra.mxu0 %v925_v34  ;;  %v916_v49 = vld [vmem:[%s1558_s10 + $0x20] sm:$0xff] }
 0x3b8   : > { %v760_v54 = vmul.f32 %v1134_v41, %v759_v48  ;;  %1041 = vmatmul.msk.f32.vlgmr.msra.gmra.mxu2 %vm485_vm5, %v613_v50 }
 0x3b9   : > { %793 = vmatpush.msrb.mxu2 %v773_v56  ;;  %935 = vmatpush.msra.mxu0 %v924_v37  ;;  %v1112_v56 = vld [vmem:[%s1555_s7] ss:$0 sm:$0xff] }
 0x3ba   : > { %v761_v59 = vadd.f32 %v1134_v41, %v760_v54 }
 0x3bb   : > { %936 = vmatpush.msra.mxu0 %v923_v39 }
 0x3bc   : > { %v765_v61 = vsel %vm764_vm7, %v1134_v41, %v761_v59  ;;  %v920_v41 = vld [vmem:[%s1558_s10 + $0x40] sm:$0xff]  ;;  %v914_v59 = vld [vmem:[%s1558_s10 + $0x10] sm:$0xff] }
 0x3bd   : > { %v770_v63 = vsel %vm767_vm8, %v769_v60, %v765_v61  ;;  %937 = vmatpush.msra.mxu0 %v922_v40  ;;  %v913_v60 = vld [vmem:[%s1558_s10 + $0x8] sm:$0xff]  ;;  %v912_v61 = vld [vmem:[%s1558_s10] sm:$0xff] }
 0x3be   : > { %v771_v1 = vmul.f32 %v1395_v13, %v770_v63 }
 0x3bf   : > { %v694_v2 = vpop.permute.xlu0 %693 }
 0x3c0   : > { %714 = vmatpush.msrb.mxu3 %v694_v2  ;;  %1047 = vmatmul.msk.f32.vlgmr.msrb.gmra.mxu2 %vm485_vm5, %v771_v1 }
 0x3c1   : > { %1044 = vmatmul.msk.f32.vlgmr.msrb.gmra.mxu3 %vm485_vm5, %v692_v3  ;;  %v1114_v3 = vld [vmem:[%s1559_s11] ss:$0 sm:$0xff] }
 0x3c2   : > { %903 = vmatpush.msra.mxu3 %v883_v29 }
 0x42d   : > { %v558_v5 = vpop.f32.mrf.mxu2 }
 0x43b   : > { %v637_v6 = vpop.f32.mrf.mxu2 }
 0x43c   : > { %799 = vrot.lane.b32.xlu0 %v637_v6, %s1213_s16  ;;  %s1033_s16 = sshll.u32 %s402_s15, 3 }
 0x43d   : > { %s404_s26 = scalar_lea.vmem [#allocation2], %s1033_s16  ;;  %s1157_s16 = scalar_lea.hbm %s1560_s12, 16 }
 0x43e   : > { %s967_s28 = sshll.u32 %s404_s26, 4  ;;  %s968_s28 = int_to_ptr.vmem [resolvable:$true] %s967_s28 }
 0x443   : > { %v795_v7 = vpop.f32.mrf.mxu2 }
 0x444   : > { %v716_v9 = vpop.f32.mrf.mxu3  ;;  %807 = vrot.lane.b32.xlu2 %v795_v7, %s1214_s17  ;;  %s1051_s17 = sshll.u32 %s1302_s25, 3  ;;  %s955_s25 = scalar_lea.sflag [#allocation3], %s402_s15 }
 0x445   : > { %803 = vrot.lane.b32.xlu1 %v716_v9, %s1215_s18  ;;  %s965_s20 = scalar_lea.hbm %s1560_s12, %s1051_s17 }
 0x446   : > { %s969_s29 = sshll.u32 %s965_s20, 4  ;;  %s970_s29 = int_to_ptr.hbm [resolvable:$true] %s969_s29 }
 0x447   : > { %s1151_s2 = sshra.s32 %s970_s29, 4  ;;  %s1152_s2 = int_to_ptr.hbm [resolvable:$true] %s1151_s2 }
 0x448   : > { %s1153_s18 = scalar_lea.hbm %s1152_s2, 8  ;;  %p1158_p0 = scmp.lt.s32.totalorder %s1152_s2, %s1560_s12 }
 0x449   : > { %p1154_p11 = scmp.ne.s32.totalorder %s1152_s2, %s1153_s18  ;;  %p1159_p1 = scmp.lt.s32.totalorder %s1157_s16, %s1153_s18 }
 0x44b   : > { %p1155_p12 = pnand %p1154_p11, %p1319_p5  ;;  %p1160_p2 = por %p1159_p1, %p1158_p0 }
 0x44d   : > { %p1156_p13 = pneg %p1155_p12 }
 0x44f   : > { %p1161_p3 = pnand %p1160_p2, %p1156_p13 }
 0x49e   : > { %v808_v16 = vpop.permute.xlu2 %807 }
 0x4ae   : > { %v800_v13 = vpop.permute.xlu0 %799 }
 0x4af   : > { %v810_v14 = vsel %vm485_vm5, %v558_v5, %v800_v13 }
 0x4b7   : > { %v804_v15 = vpop.permute.xlu1 %803 }
 0x4b8   : > { %v812_v17 = vsel %vm811_vm9, %v810_v14, %v804_v15 }
 0x4b9   : > { %v814_v18 = vsel %vm813_vm10, %v812_v17, %v808_v16 }
 0x4ba   : > { %1048 = vmatmul.msk.f32.vlgmr.msrb.gmra.mxu1 %vm412_vm0, %v814_v18 }
 0x537   : > { %v839_v20 = vpop.f32.mrf.mxu1 }
 0x538   : > { %v842_v21 = vadd.f32 %v839_v20, %v1334_v0  ;;  %v882_v0 = vld [vmem:[%s1556_s8 + $0x10] sm:$0xff] }
 0x539   : > { %904 = vmatpush.msra.mxu3 %v882_v0 }
 0x53a   : > { %v1433_v22 = vadd.f32 %v1110_v19, %v842_v21 }
 0x53b   : > { %905 = vmatpush.msra.mxu3 %v881_v30 }
 0x53c   : > { %v850_v23 = vsel %vm412_vm0, %v1433_v22, 0.0 }
 0x53d   : > { %851 = vadd.xlane.f32.xlu0 %v850_v23  ;;  %906 = vmatpush.msra.mxu3 %v880_v31 }
 0x5b0   : > { %v852_v24 = vpop.xlane.xlu0 %851 }
 0x5b1   : > { %v853_v25 = vmul.f32 %v852_v24, %v1338_v8 }
 0x5b3   : > { %v854_v26 = vsub.f32 %v1433_v22, %v853_v25 }
 0x5b5   : > { %v855_v27 = vmul.f32 %v854_v26, %v854_v26 }
 0x5b7   : > { %v856_v28 = vsel %vm412_vm0, %v855_v27, 0.0 }
 0x5b8   : > { %857 = vadd.xlane.f32.xlu1 %v856_v28 }
 0x62b   : > { %v858_v35 = vpop.xlane.xlu1 %857 }
 0x62c   : > { %v859_v36 = vmul.f32 %v858_v35, %v1338_v8  ;;  %v921_v8 = vld [vmem:[%s1558_s10 + $0x48] sm:$0xff] }
 0x62d   : > { %938 = vmatpush.msra.mxu0 %v921_v8 }
 0x62e   : > { %v860_v38 = vadd.f32 1e-05, %v859_v36 }
 0x62f   : > { %939 = vmatpush.msra.mxu0 %v920_v41 }
 0x630   : > { %1135 = vrsqrt.f32 %v860_v38  ;;  %vm867_vm11 = vweird.f32 %v860_v38 }
 0x631   : > { %940 = vmatpush.msra.mxu0 %v919_v43 }
 0x633   : > { %941 = vmatpush.msra.mxu0 %v918_v45 }
 0x635   : > { %942 = vmatpush.msra.mxu0 %v917_v47 }
 0x636   : > { %v1136_v42 = vpop.eup %1135 }
 0x637   : > { %v862_v44 = vmul.f32 %v1136_v42, %v860_v38  ;;  %vm868_vm5 = vweird.f32 %v1136_v42  ;;  %943 = vmatpush.msra.mxu0 %v916_v49 }
 0x638   : > { %vm869_vm12 = vmor %vm867_vm11, %vm868_vm5 }
 0x639   : > { %v863_v46 = vmul.f32 %v1136_v42, %v862_v44  ;;  %944 = vmatpush.msra.mxu0 %v915_v51 }
 0x63b   : > { %v864_v48 = vmul.f32 0.5, %v863_v46  ;;  %945 = vmatpush.msra.mxu0 %v914_v59 }
 0x63d   : > { %v865_v50 = vsub.f32 1.5, %v864_v48  ;;  %946 = vmatpush.msra.mxu0 %v913_v60 }
 0x63f   : > { %v866_v52 = vmul.f32 %v1136_v42, %v865_v50  ;;  %947 = vmatpush.msra.mxu0 %v912_v61 }
 0x641   : > { %v870_v54 = vsel %vm869_vm12, %v1136_v42, %v866_v52 }
 0x642   : > { %v871_v55 = vmul.f32 %v870_v54, %v854_v26 }
 0x644   : > { %v875_v57 = vmul.f32 %v1111_v53, %v871_v55 }
 0x646   : > { %v879_v58 = vadd.f32 %v1112_v56, %v875_v57 }
 0x648   : > { %1049 = vmatmul.msk.f32.vlgmr.msra.gmra.mxu3 %vm412_vm0, %v879_v58 }
 0x6cb   : > { %v908_v63 = vpop.f32.mrf.mxu3 }
 0x6cc   : > { %v909_v1 = vadd.f32 %v1113_v62, %v908_v63 }
 0x6ce   : > { %v911_v2 = vmax.f32 %v909_v1, 0.0 }
 0x6d0   : > { %948 = vmatmul.f32.vlgmr.msra.gmra.mxu0 %v911_v2 }
 0x74d   : > { %v949_v5 = vpop.f32.mrf.mxu0 }
 0x74e   : > { %v950_v6 = vadd.f32 %v1114_v3, %v949_v5 }
 0x750   : > { %v952_v7 = vadd.f32 %v950_v6, %v1433_v22 }
 0x752   : > { %953 = vst.msk [vmem:[%s404_s26] sm:$0xff] %vm412_vm0, %v952_v7 }
 0x753   : > { %1164 = shalt.err (!%p1161_p3)
}
 0x754   : > { %1054 = dma.vmem_to_hbm [thread:$0]  (%p1319_p5), %s968_s28, 128, %s970_s29, %s955_s25  }
 0x755 PF: > { %p1060_p4 = scmp.ge.s32.totalorder %s1199_s24, 2  ;;  %s981_s15 = sand.u32 1, %s1187_s21  }
 0x756   : > { %s982_s20 = scalar_lea.sflag [#allocation3], %s981_s15 }
 0x757   : > { %p1057_p7 = pnand %p1060_p4, %p1323_p6 }
 0x759   : > { %p1058_p8 = pneg %p1057_p7 }
 0x75b   : > { %1182 = dma.done.wait (%p1058_p8), %s982_s20, 128  }
 0x75c   : > { %1184 = vsyncadd (%p1058_p8), %s982_s20, 4294967168  ;;  %p22_p9 = scmp.ge.s32.totalorder %s1306_s27, 4   ;;  %s1571_s21 = smov %s1191_s22 }
 0x75d   : > { %s1572_s22 = smov %s1195_s23  ;;  %s1573_s23 = smov %s1317_s30 }
 0x75e   : > { %s1574_s24 = smov %s1306_s27  ;;  %24 = sbr.rel (!%p22_p9) target bundleno = 7 (0x7), region = 103 }
 0x763   :  { %988 = vsyncpa [#allocation3], 1 }
 0x764   :  { %990 = vsyncpa [#allocation3 + $0x1], 1 }

// kernel: tpu_custom_call.1
= control target key start
LH: loop header
LB: loop body
LE: loop exit
PB: predicated region body
PF: predicated region fallthrough
CT: control target
= control target key end

     0   :  { %s1548_s0 = inlined_call_operand.vmem [shape: f32[2,8,32], index: 0, kind: input, shape index: {}]   ;;  %s1549_s1 = inlined_call_operand.vmem [shape: f32[32,96], index: 1, kind: input, shape index: {}]   ;;  %s1550_s2 = inlined_call_operand.vmem [shape: f32[32,32], index: 2, kind: input, shape index: {}]   ;;  %s1551_s3 = inlined_call_operand.vmem [shape: f32[1,32], index: 3, kind: input, shape index: {}]   ;;  %s1552_s4 = inlined_call_operand.vmem [shape: f32[1,32], index: 4, kind: input, shape index: {}]   ;;  %s1553_s5 = inlined_call_operand.vmem [shape: f32[1,32], index: 5, kind: input, shape index: {}]   ;;  %s1554_s6 = inlined_call_operand.vmem [shape: f32[1,32], index: 6, kind: input, shape index: {}]   ;;  %s1555_s7 = inlined_call_operand.vmem [shape: f32[1,32], index: 7, kind: input, shape index: {}]   ;;  %s1556_s8 = inlined_call_operand.vmem [shape: f32[32,128], index: 8, kind: input, shape index: {}]   ;;  %s1557_s9 = inlined_call_operand.vmem [shape: f32[1,128], index: 9, kind: input, shape index: {}]   ;;  %s1558_s10 = inlined_call_operand.vmem [shape: f32[128,32], index: 10, kind: input, shape index: {}]   ;;  %s1559_s11 = inlined_call_operand.vmem [shape: f32[1,32], index: 11, kind: input, shape index: {}]   ;;  %s1560_s12 = inlined_call_operand.hbm [shape: f32[2,8,32], index: 12, kind: output, shape index: {}]  }
   0x1   :  { %1561 = sst [smem:[#allocation5_spill]] %s1548_s0 }
   0x2   :  { %1562 = sst [smem:[#allocation6_spill]] %s1549_s1 }
   0x3   :  { %1563 = sst [smem:[#allocation7_spill]] %s1550_s2 }
   0x4   :  { %17 = vsyncpa [#allocation3], 0 }
   0x5   :  { %19 = vsyncpa [#allocation3 + $0x1], 0  ;;  %s1281_s21 = smov 0   ;;  %s1283_s22 = smov 0  }
   0x6   :  { %s1285_s23 = smov 0   ;;  %s1287_s24 = smov 0  }
   0x7 LB: > { %s1302_s25 = sadd.s32 4294967295, %s1199_s24   ;;  %s1029_s26 = sadd.s32 4294967294, %s1199_s24   ;;  %s1199_s24 = sphi %s1287_s24, %s1574_s24   ;;  %s1195_s23 = sphi %s1285_s23, %s1573_s23   ;;  %s1191_s22 = sphi %s1283_s22, %s1572_s22   ;;  %s1187_s21 = sphi %s1281_s21, %s1571_s21  }
   0x8   : > { %s1306_s27 = sadd.s32 1, %s1199_s24   ;;  %s289_s28 = sadd.s32 1, %s1195_s23 }
   0x9   : > { %s286_s29 = ssub.s32 %s1199_s24, %s1306_s27  ;;  %p299_p0 = scmp.ne.s32.totalorder %s1195_s23, %s1191_s22 }
   0xa   : > { %p287_p1 = scmp.eq.s32.totalorder %s286_s29, 0  ;;  %p300_p2 = scmp.eq.s32.totalorder %s1302_s25, 1 }
   0xb   : > { %p305_p3 = scmp.ne.s32.totalorder %s1191_s22, %s1187_s21  ;;  %p306_p4 = scmp.eq.s32.totalorder %s1029_s26, 1 }
   0xc   : > { %s1317_s30 = scalar_select %p287_p1, %s1195_s23, %s289_s28  }
   0xd   : > { %p1319_p5 = por %p300_p2, %p299_p0  ;;  %p1323_p6 = por %p306_p4, %p305_p3 }
   0xe   : > { %p1032_p7 = scmp.ge.s32.totalorder %s1199_s24, 1  ;;  %p364_p8 = scmp.lt.s32.totalorder %s1199_s24, 3 }
  0x10   : > { %p365_p9 = pnand %p1032_p7, %p364_p8 }
  0x11   : > { %p405_p10 = scmp.lt.s32.totalorder (!%p365_p9), %s1302_s25, 1  ;;  %s1566_s0 = sld [smem:[#allocation5_spill]] (!%p365_p9) }
  0x12   : > { %368 = sbr.rel (%p365_p9) target bundleno = 1877 (0x755), region = 68  ;;  %s1567_s1 = sld [smem:[#allocation6_spill]] (!%p365_p9) }
  0x13   : > { %s1202_s29 = smov (!%p365_p9), 112   ;;  %s1205_s17 = smov (!%p365_p9), 80  }
  0x14   : > { %s1206_s18 = smov (!%p365_p9), 88   ;;  %s1208_s20 = smov (!%p365_p9), 72  }
  0x15   : > { %s1209_s26 = smov (!%p365_p9), 64   ;;  %s1210_s28 = smov (!%p365_p9), 56  }
  0x16   : > { %s1570_s2 = sld [smem:[#allocation7_spill]] (!%p365_p9) }
  0x17   : > { %s406_s15 = scalar_select %p405_p10, %s1302_s25, 1  ;;  %vm412_vm0 = vcmask 261120   ;;  %v1201_v2 = vmov 32.0   ;;  %v1108_v27 = vld [vmem:[%s1552_s4] ss:$0 sm:$0xff]  ;;  %vm485_vm5 = vcmask 64512   ;;  %v477_v41 = vlaneseq }
  0x18   : > { %1115 = vrcp.f32 %v1201_v2  ;;  %v453_v14 = vld [vmem:[%s1567_s1 + $0x18] sm:$0xff]  ;;  %v452_v15 = vld [vmem:[%s1567_s1 + $0x10] sm:$0xff]  ;;  %v451_v16 = vld [vmem:[%s1567_s1 + $0x8] sm:$0xff] }
  0x19   : > { %s1034_s16 = sshll.u32 %s406_s15, 3  ;;  %469 = vmatpush.msra.mxu2 %v453_v14  ;;  %v450_v17 = vld [vmem:[%s1567_s1] sm:$0xff]  ;;  %s1203_s15 = smov 120   ;;  %v478_v42 = vshrl.u32 %v477_v41, 7  ;;  %v480_v43 = vand.u32 127, %v477_v41 }
  0x1a   : > { %s408_s19 = scalar_lea.vmem %s1566_s0, %s1034_s16  ;;  %v1109_v30 = vld [vmem:[%s1553_s5] ss:$0 sm:$0xff]  ;;  %s1204_s16 = smov 96  }
  0x1b   : > { %v1334_v0 = vld [vmem:[%s408_s19] sm:$0xff]  ;;  %470 = vmatpush.msra.mxu2 %v452_v15  ;;  %s1207_s19 = smov 104   ;;  %vm481_vm6 = vcmp.le.s32.totalorder %v480_v43, %v478_v42 }
  0x1c   : > { %v413_v1 = vsel %vm412_vm0, %v1334_v0, 0.0 }
  0x1d   : > { %414 = vadd.xlane.f32.xlu0 %v413_v1  ;;  %471 = vmatpush.msra.mxu2 %v451_v16 }
  0x1e   : > { %v1116_v3 = vpop.eup %1115 }
  0x1f   : > { %v417_v4 = vmul.f32 32.0, %v1116_v3  ;;  %vm421_vm1 = vweird.f32 %v1116_v3  ;;  %472 = vmatpush.msra.mxu2 %v450_v17 }
  0x21   : > { %v418_v5 = vsub.f32 1.0, %v417_v4 }
  0x23   : > { %v419_v6 = vmul.f32 %v1116_v3, %v418_v5 }
  0x25   : > { %v420_v7 = vadd.f32 %v1116_v3, %v419_v6 }
  0x27   : > { %v1338_v8 = vsel %vm421_vm1, %v1116_v3, %v420_v7 }
  0x90   : > { %v415_v9 = vpop.xlane.xlu0 %414 }
  0x91   : > { %v423_v10 = vmul.f32 %v1338_v8, %v415_v9 }
  0x93   : > { %v424_v11 = vsub.f32 %v1334_v0, %v423_v10 }
  0x95   : > { %v425_v12 = vmul.f32 %v424_v11, %v424_v11 }
  0x97   : > { %v426_v13 = vsel %vm412_vm0, %v425_v12, 0.0 }
  0x98   : > { %427 = vadd.xlane.f32.xlu0 %v426_v13 }
 0x10b   : > { %v428_v18 = vpop.xlane.xlu0 %427 }
 0x10c   : > { %v429_v19 = vmul.f32 %v428_v18, %v1338_v8 }
 0x10e   : > { %v430_v20 = vadd.f32 1e-05, %v429_v19 }
 0x110   : > { %1117 = vrsqrt.f32 %v430_v20  ;;  %vm437_vm3 = vweird.f32 %v430_v20 }
 0x116   : > { %v1118_v21 = vpop.eup %1117 }
 0x117   : > { %v432_v22 = vmul.f32 %v1118_v21, %v430_v20  ;;  %vm438_vm2 = vweird.f32 %v1118_v21 }
 0x118   : > { %vm439_vm4 = vmor %vm437_vm3, %vm438_vm2 }
 0x119   : > { %v433_v23 = vmul.f32 %v1118_v21, %v432_v22 }
 0x11b   : > { %v434_v24 = vmul.f32 0.5, %v433_v23 }
 0x11d   : > { %v435_v25 = vsub.f32 1.5, %v434_v24 }
 0x11f   : > { %v436_v26 = vmul.f32 %v1118_v21, %v435_v25 }
 0x121   : > { %v440_v28 = vsel %vm439_vm4, %v1118_v21, %v436_v26 }
 0x122   : > { %v441_v29 = vmul.f32 %v440_v28, %v424_v11 }
 0x124   : > { %v445_v31 = vmul.f32 %v1108_v27, %v441_v29 }
 0x126   : > { %v449_v32 = vadd.f32 %v1109_v30, %v445_v31 }
 0x128   : > { %1035 = vmatmul.msk.f32.vlgmr.msra.gmra.mxu2 %vm412_vm0, %v449_v32 }
 0x1ab   : > { %v1363_v33 = vpop.f32.mrf.mxu2 }
 0x1ac   : > { %640 = vrot.lane.b32.xlu0 %v1363_v33, %s1202_s29  ;;  %561 = vrot.lane.b32.xlu2 %v1363_v33, %s1203_s15  ;;  %s1211_s29 = smov 40   ;;  %s1212_s15 = smov 48  }
 0x1ad   : > { %483 = vrot.lane.b32.xlu1 %v1363_v33, %s1204_s16  ;;  %s1213_s16 = smov 8  }
 0x1b4   : > { %642 = vrot.lane.b32.xlu2 %v1363_v33, %s1205_s17  ;;  %s1214_s17 = smov 24  }
 0x1b5   : > { %563 = vrot.lane.b32.xlu1 %v1363_v33, %s1206_s18  ;;  %s1215_s18 = smov 16  }
 0x1bc   : > { %719 = vrot.lane.b32.xlu2 %v1363_v33, %s1207_s19 }
 0x1bd   : > { %721 = vrot.lane.b32.xlu1 %v1363_v33, %s1208_s20 }
 0x206   : > { %v562_v34 = vpop.permute.xlu2 %561 }
 0x20e   : > { %v643_v36 = vpop.permute.xlu2 %642 }
 0x216   : > { %v720_v40 = vpop.permute.xlu2 %719 }
 0x21e   : > { %v641_v38 = vpop.permute.xlu0 %640 }
 0x21f   : > { %v484_v35 = vpop.permute.xlu1 %483 }
 0x220   : > { %1036 = vmatpush.xpose.msk.msra.mxu1 %vm485_vm5, %v484_v35 }
 0x223   : > { %1037 = vmatmul.msk.f32.vlgmr.msra.gmra.mxu1 %vm485_vm5, %v1363_v33 }
 0x224   : > { %1042 = vmatpush.xpose.msk.msrb.mxu1 %vm485_vm5, %v643_v36 }
 0x227   : > { %v564_v37 = vpop.permute.xlu1 %563 }
 0x228   : > { %1039 = vmatpush.xpose.msk.msra.mxu3 %vm485_vm5, %v564_v37 }
 0x22b   : > { %1040 = vmatmul.msk.f32.vlgmr.msra.gmra.mxu3 %vm485_vm5, %v562_v34  ;;  %1043 = vmatmul.msk.f32.vlgmr.msrb.gmra.mxu1 %vm485_vm5, %v641_v38 }
 0x22f   : > { %v722_v39 = vpop.permute.xlu1 %721 }
 0x230   : > { %1045 = vmatpush.xpose.msk.msra.mxu1 %vm485_vm5, %v722_v39 }
 0x233   : > { %1046 = vmatmul.msk.f32.vlgmr.msra.gmra.mxu1 %vm485_vm5, %v720_v40 }
 0x2a0   : > { %v507_v44 = vpop.f32.mrf.mxu1 }
 0x2a1   : > { %v510_v45 = vsel %vm481_vm6, %v507_v44, -1e+30 }
 0x2a2   : > { %v511_v46 = vsel %vm485_vm5, %v510_v45, -inf }
 0x2a3   : > { %512 = vmax.xlane.f32.xlu1 %v511_v46 }
 0x2a8   : > { %v665_v47 = vpop.f32.mrf.mxu1 }
 0x2a9   : > { %v668_v48 = vsel %vm481_vm6, %v665_v47, -1e+30 }
 0x2aa   : > { %v669_v49 = vsel %vm485_vm5, %v668_v48, -inf }
 0x2ab   : > { %670 = vmax.xlane.f32.xlu0 %v669_v49 }
 0x2ae   : > { %v586_v50 = vpop.f32.mrf.mxu3 }
 0x2af   : > { %v589_v51 = vsel %vm481_vm6, %v586_v50, -1e+30 }
 0x2b0   : > { %v590_v52 = vsel %vm485_vm5, %v589_v51, -inf  ;;  %v744_v53 = vpop.f32.mrf.mxu1 }
 0x2b1   : > { %591 = vmax.xlane.f32.xlu2 %v590_v52  ;;  %v747_v54 = vsel %vm481_vm6, %v744_v53, -1e+30  ;;  %v1111_v53 = vld [vmem:[%s1554_s6] ss:$0 sm:$0xff] }
 0x2b2   : > { %v748_v55 = vsel %vm485_vm5, %v747_v54, -inf }
 0x2b9   : > { %749 = vmax.xlane.f32.xlu2 %v748_v55 }
 0x2d1   : > { %535 = vrot.lane.b32.xlu2 %v1363_v33, %s1209_s26 }
 0x316   : > { %v513_v56 = vpop.xlane.xlu1 %512 }
 0x317   : > { %v514_v57 = vsub.f32 %v510_v45, %v513_v56 }
 0x319   : > { %v515_v58 = vmul.f32 1.442695, %v514_v57 }
 0x31b   : > { %1119 = vpow2.f32 %v515_v58 }
 0x31e   : > { %v671_v59 = vpop.xlane.xlu0 %670 }
 0x31f   : > { %v672_v60 = vsub.f32 %v668_v48, %v671_v59 }
 0x321   : > { %v1120_v61 = vpop.eup %1119  ;;  %v673_v62 = vmul.f32 1.442695, %v672_v60 }
 0x322   : > { %v517_v63 = vsel %vm485_vm5, %v1120_v61, 0.0 }
 0x323   : > { %1121 = vpow2.f32 %v673_v62  ;;  %518 = vadd.xlane.f32.xlu1 %v517_v63 }
 0x324   : > { %v592_v1 = vpop.xlane.xlu2 %591 }
 0x325   : > { %v593_v2 = vsub.f32 %v589_v51, %v592_v1 }
 0x327   : > { %v594_v3 = vmul.f32 1.442695, %v593_v2 }
 0x329   : > { %v1387_v4 = vpop.eup %1121  ;;  %1123 = vpow2.f32 %v594_v3 }
 0x32a   : > { %v675_v5 = vsel %vm485_vm5, %v1387_v4, 0.0 }
 0x32b   : > { %676 = vadd.xlane.f32.xlu1 %v675_v5 }
 0x32c   : > { %v750_v6 = vpop.xlane.xlu2 %749 }
 0x32d   : > { %v751_v7 = vsub.f32 %v747_v54, %v750_v6 }
 0x32f   : > { %v1391_v9 = vpop.eup %1123  ;;  %v752_v10 = vmul.f32 1.442695, %v751_v7 }
 0x330   : > { %v596_v11 = vsel %vm485_vm5, %v1391_v9, 0.0 }
 0x331   : > { %1125 = vpow2.f32 %v752_v10  ;;  %597 = vadd.xlane.f32.xlu2 %v596_v11  ;;  %v818_v10 = vld [vmem:[%s1570_s2 + $0x18] sm:$0xff]  ;;  %v816_v11 = vld [vmem:[%s1570_s2 + $0x8] sm:$0xff] }
 0x332   : > { %834 = vmatpush.msrb.mxu1 %v818_v10 }
 0x334   : > { %v536_v12 = vpop.permute.xlu2 %535 }
 0x335   : > { %556 = vmatpush.msrb.mxu2 %v536_v12  ;;  %v815_v12 = vld [vmem:[%s1570_s2] sm:$0xff] }
 0x337   : > { %v1395_v13 = vpop.eup %1125 }
 0x338   : > { %v754_v14 = vsel %vm485_vm5, %v1395_v13, 0.0 }
 0x339   : > { %755 = vadd.xlane.f32.xlu0 %v754_v14 }
 0x344   : > { %614 = vrot.lane.b32.xlu1 %v1363_v33, %s1210_s28 }
 0x349   : > { %772 = vrot.lane.b32.xlu2 %v1363_v33, %s1211_s29 }
 0x34d   : > { %693 = vrot.lane.b32.xlu0 %v1363_v33, %s1212_s15  ;;  %s402_s15 = sand.u32 1, %s1191_s22  }
 0x396   : > { %v519_v15 = vpop.xlane.xlu1 %518 }
 0x397   : > { %1127 = vrcp.f32 %v519_v15  ;;  %v531_v20 = vand.u32 2147483648, %v519_v15  ;;  %v529_v22 = vand.u32 2147483647, %v519_v15  ;;  %vm525_vm8 = vweird.f32 %v519_v15 }
 0x399   : > { %v532_v25 = vor.u32 1.1754944e-38, %v531_v20  ;;  %vm530_vm10 = vcmp.eq.f32.partialorder %v529_v22, 8.507059e+37 }
 0x39d   : > { %v1128_v16 = vpop.eup %1127 }
 0x39e   : > { %v521_v17 = vmul.f32 %v1128_v16, %v519_v15  ;;  %v677_v18 = vpop.xlane.xlu1 %676  ;;  %vm526_vm7 = vweird.f32 %v1128_v16 }
 0x39f   : > { %1129 = vrcp.f32 %v677_v18  ;;  %vm527_vm9 = vmor %vm525_vm8, %vm526_vm7  ;;  %v689_v47 = vand.u32 2147483648, %v677_v18  ;;  %vm683_vm1 = vweird.f32 %v677_v18  ;;  %v687_v51 = vand.u32 2147483647, %v677_v18 }
 0x3a0   : > { %v522_v19 = vsub.f32 1.0, %v521_v17 }
 0x3a1   : > { %v690_v58 = vor.u32 1.1754944e-38, %v689_v47  ;;  %vm688_vm6 = vcmp.eq.f32.partialorder %v687_v51, 8.507059e+37  ;;  %v917_v47 = vld [vmem:[%s1558_s10 + $0x28] sm:$0xff]  ;;  %v915_v51 = vld [vmem:[%s1558_s10 + $0x18] sm:$0xff] }
 0x3a2   : > { %v523_v21 = vmul.f32 %v1128_v16, %v522_v19  ;;  %v1110_v19 = vld [vmem:[%s1551_s3] ss:$0 sm:$0xff] }
 0x3a4   : > { %v524_v23 = vadd.f32 %v1128_v16, %v523_v21  ;;  %v598_v24 = vpop.xlane.xlu2 %597 }
 0x3a5   : > { %1131 = vrcp.f32 %v598_v24  ;;  %v1130_v26 = vpop.eup %1129  ;;  %v610_v36 = vand.u32 2147483648, %v598_v24  ;;  %v608_v38 = vand.u32 2147483647, %v598_v24  ;;  %vm604_vm12 = vweird.f32 %v598_v24 }
 0x3a6   : > { %v528_v27 = vsel %vm527_vm9, %v1128_v16, %v524_v23  ;;  %v679_v30 = vmul.f32 %v1130_v26, %v677_v18  ;;  %vm684_vm15 = vweird.f32 %v1130_v26  ;;  %vm811_vm9 = vcmask 130048  }
 0x3a7   : > { %v533_v28 = vsel %vm530_vm10, %v532_v25, %v528_v27  ;;  %v611_v42 = vor.u32 1.1754944e-38, %v610_v36  ;;  %vm609_vm14 = vcmp.eq.f32.partialorder %v608_v38, 8.507059e+37  ;;  %vm1404_vm2 = vmor %vm683_vm1, %vm684_vm15  ;;  %vm813_vm10 = vcmask 195584  }
 0x3a8   : > { %v534_v29 = vmul.f32 %v1120_v61, %v533_v28  ;;  %v680_v34 = vsub.f32 1.0, %v679_v30  ;;  %v881_v30 = vld [vmem:[%s1556_s8 + $0x8] sm:$0xff] }
 0x3aa   : > { %1038 = vmatmul.msk.f32.vlgmr.msrb.gmra.mxu2 %vm485_vm5, %v534_v29  ;;  %v681_v39 = vmul.f32 %v1130_v26, %v680_v34  ;;  %v883_v29 = vld [vmem:[%s1556_s8 + $0x18] sm:$0xff]  ;;  %v925_v34 = vld [vmem:[%s1558_s10 + $0x68] sm:$0xff] }
 0x3ab   : > { %v1132_v31 = vpop.eup %1131 }
 0x3ac   : > { %v600_v32 = vmul.f32 %v1132_v31, %v598_v24  ;;  %v756_v33 = vpop.xlane.xlu0 %755  ;;  %vm605_vm11 = vweird.f32 %v1132_v31  ;;  %v682_v45 = vadd.f32 %v1130_v26, %v681_v39  ;;  %v773_v56 = vpop.permute.xlu2 %772  ;;  %v923_v39 = vld [vmem:[%s1558_s10 + $0x58] sm:$0xff] }
 0x3ad   : > { %1133 = vrcp.f32 %v756_v33  ;;  %vm606_vm13 = vmor %vm604_vm12, %vm605_vm11  ;;  %v768_v52 = vand.u32 2147483648, %v756_v33  ;;  %v766_v55 = vand.u32 2147483647, %v756_v33  ;;  %vm762_vm4 = vweird.f32 %v756_v33 }
 0x3ae   : > { %v601_v35 = vsub.f32 1.0, %v600_v32  ;;  %v686_v57 = vsel %vm1404_vm2, %v1130_v26, %v682_v45  ;;  %v927_v32 = vld [vmem:[%s1558_s10 + $0x78] sm:$0xff]  ;;  %v918_v45 = vld [vmem:[%s1558_s10 + $0x30] sm:$0xff] }
 0x3af   : > { %v769_v60 = vor.u32 1.1754944e-38, %v768_v52  ;;  %vm767_vm8 = vcmp.eq.f32.partialorder %v766_v55, 8.507059e+37  ;;  %v691_v62 = vsel %vm688_vm6, %v690_v58, %v686_v57  ;;  %932 = vmatpush.msra.mxu0 %v927_v32 }
 0x3b0   : > { %v602_v37 = vmul.f32 %v1132_v31, %v601_v35  ;;  %v692_v3 = vmul.f32 %v1387_v4, %v691_v62  ;;  %v817_v4 = vld [vmem:[%s1570_s2 + $0x10] sm:$0xff]  ;;  %v1113_v62 = vld [vmem:[%s1557_s9] ss:$0 sm:$0xff] }
 0x3b1   : > { %835 = vmatpush.msrb.mxu1 %v817_v4 }
 0x3b2   : > { %v603_v40 = vadd.f32 %v1132_v31, %v602_v37  ;;  %v924_v37 = vld [vmem:[%s1558_s10 + $0x60] sm:$0xff] }
 0x3b3   : > { %v1134_v41 = vpop.eup %1133  ;;  %836 = vmatpush.msrb.mxu1 %v816_v11 }
 0x3b4   : > { %v607_v43 = vsel %vm606_vm13, %v1132_v31, %v603_v40  ;;  %v758_v44 = vmul.f32 %v1134_v41, %v756_v33  ;;  %vm763_vm3 = vweird.f32 %v1134_v41  ;;  %v880_v31 = vld [vmem:[%s1556_s8] sm:$0xff]  ;;  %v926_v33 = vld [vmem:[%s1558_s10 + $0x70] sm:$0xff] }
 0x3b5   : > { %v612_v46 = vsel %vm609_vm14, %v611_v42, %v607_v43  ;;  %vm764_vm7 = vmor %vm762_vm4, %vm763_vm3  ;;  %837 = vmatpush.msrb.mxu1 %v815_v12  ;;  %933 = vmatpush.msra.mxu0 %v926_v33  ;;  %v922_v40 = vld [vmem:[%s1558_s10 + $0x50] sm:$0xff]  ;;  %v919_v43 = vld [vmem:[%s1558_s10 + $0x38] sm:$0xff] }
 0x3b6   : > { %v759_v48 = vsub.f32 1.0, %v758_v44  ;;  %v615_v49 = vpop.permute.xlu1 %614  ;;  %v613_v50 = vmul.f32 %v1391_v9, %v612_v46 }
 0x3b7   : > { %635 = vmatpush.msra.mxu2 %v615_v49  ;;  %934 = vmatpush.msra.mxu0 %v925_v34  ;;  %v916_v49 = vld [vmem:[%s1558_s10 + $0x20] sm:$0xff] }
 0x3b8   : > { %v760_v54 = vmul.f32 %v1134_v41, %v759_v48  ;;  %1041 = vmatmul.msk.f32.vlgmr.msra.gmra.mxu2 %vm485_vm5, %v613_v50 }
 0x3b9   : > { %793 = vmatpush.msrb.mxu2 %v773_v56  ;;  %935 = vmatpush.msra.mxu0 %v924_v37  ;;  %v1112_v56 = vld [vmem:[%s1555_s7] ss:$0 sm:$0xff] }
 0x3ba   : > { %v761_v59 = vadd.f32 %v1134_v41, %v760_v54 }
 0x3bb   : > { %936 = vmatpush.msra.mxu0 %v923_v39 }
 0x3bc   : > { %v765_v61 = vsel %vm764_vm7, %v1134_v41, %v761_v59  ;;  %v920_v41 = vld [vmem:[%s1558_s10 + $0x40] sm:$0xff]  ;;  %v914_v59 = vld [vmem:[%s1558_s10 + $0x10] sm:$0xff] }
 0x3bd   : > { %v770_v63 = vsel %vm767_vm8, %v769_v60, %v765_v61  ;;  %937 = vmatpush.msra.mxu0 %v922_v40  ;;  %v913_v60 = vld [vmem:[%s1558_s10 + $0x8] sm:$0xff]  ;;  %v912_v61 = vld [vmem:[%s1558_s10] sm:$0xff] }
 0x3be   : > { %v771_v1 = vmul.f32 %v1395_v13, %v770_v63 }
 0x3bf   : > { %v694_v2 = vpop.permute.xlu0 %693 }
 0x3c0   : > { %714 = vmatpush.msrb.mxu3 %v694_v2  ;;  %1047 = vmatmul.msk.f32.vlgmr.msrb.gmra.mxu2 %vm485_vm5, %v771_v1 }
 0x3c1   : > { %1044 = vmatmul.msk.f32.vlgmr.msrb.gmra.mxu3 %vm485_vm5, %v692_v3  ;;  %v1114_v3 = vld [vmem:[%s1559_s11] ss:$0 sm:$0xff] }
 0x3c2   : > { %903 = vmatpush.msra.mxu3 %v883_v29 }
 0x42d   : > { %v558_v5 = vpop.f32.mrf.mxu2 }
 0x43b   : > { %v637_v6 = vpop.f32.mrf.mxu2 }
 0x43c   : > { %799 = vrot.lane.b32.xlu0 %v637_v6, %s1213_s16  ;;  %s1033_s16 = sshll.u32 %s402_s15, 3 }
 0x43d   : > { %s404_s26 = scalar_lea.vmem [#allocation2], %s1033_s16  ;;  %s1157_s16 = scalar_lea.hbm %s1560_s12, 16 }
 0x43e   : > { %s967_s28 = sshll.u32 %s404_s26, 4  ;;  %s968_s28 = int_to_ptr.vmem [resolvable:$true] %s967_s28 }
 0x443   : > { %v795_v7 = vpop.f32.mrf.mxu2 }
 0x444   : > { %v716_v9 = vpop.f32.mrf.mxu3  ;;  %807 = vrot.lane.b32.xlu2 %v795_v7, %s1214_s17  ;;  %s1051_s17 = sshll.u32 %s1302_s25, 3  ;;  %s955_s25 = scalar_lea.sflag [#allocation3], %s402_s15 }
 0x445   : > { %803 = vrot.lane.b32.xlu1 %v716_v9, %s1215_s18  ;;  %s965_s20 = scalar_lea.hbm %s1560_s12, %s1051_s17 }
 0x446   : > { %s969_s29 = sshll.u32 %s965_s20, 4  ;;  %s970_s29 = int_to_ptr.hbm [resolvable:$true] %s969_s29 }
 0x447   : > { %s1151_s2 = sshra.s32 %s970_s29, 4  ;;  %s1152_s2 = int_to_ptr.hbm [resolvable:$true] %s1151_s2 }
 0x448   : > { %s1153_s18 = scalar_lea.hbm %s1152_s2, 8  ;;  %p1158_p0 = scmp.lt.s32.totalorder %s1152_s2, %s1560_s12 }
 0x449   : > { %p1154_p11 = scmp.ne.s32.totalorder %s1152_s2, %s1153_s18  ;;  %p1159_p1 = scmp.lt.s32.totalorder %s1157_s16, %s1153_s18 }
 0x44b   : > { %p1155_p12 = pnand %p1154_p11, %p1319_p5  ;;  %p1160_p2 = por %p1159_p1, %p1158_p0 }
 0x44d   : > { %p1156_p13 = pneg %p1155_p12 }
 0x44f   : > { %p1161_p3 = pnand %p1160_p2, %p1156_p13 }
 0x49e   : > { %v808_v16 = vpop.permute.xlu2 %807 }
 0x4ae   : > { %v800_v13 = vpop.permute.xlu0 %799 }
 0x4af   : > { %v810_v14 = vsel %vm485_vm5, %v558_v5, %v800_v13 }
 0x4b7   : > { %v804_v15 = vpop.permute.xlu1 %803 }
 0x4b8   : > { %v812_v17 = vsel %vm811_vm9, %v810_v14, %v804_v15 }
 0x4b9   : > { %v814_v18 = vsel %vm813_vm10, %v812_v17, %v808_v16 }
 0x4ba   : > { %1048 = vmatmul.msk.f32.vlgmr.msrb.gmra.mxu1 %vm412_vm0, %v814_v18 }
 0x537   : > { %v839_v20 = vpop.f32.mrf.mxu1 }
 0x538   : > { %v842_v21 = vadd.f32 %v839_v20, %v1334_v0  ;;  %v882_v0 = vld [vmem:[%s1556_s8 + $0x10] sm:$0xff] }
 0x539   : > { %904 = vmatpush.msra.mxu3 %v882_v0 }
 0x53a   : > { %v1433_v22 = vadd.f32 %v1110_v19, %v842_v21 }
 0x53b   : > { %905 = vmatpush.msra.mxu3 %v881_v30 }
 0x53c   : > { %v850_v23 = vsel %vm412_vm0, %v1433_v22, 0.0 }
 0x53d   : > { %851 = vadd.xlane.f32.xlu0 %v850_v23  ;;  %906 = vmatpush.msra.mxu3 %v880_v31 }
 0x5b0   : > { %v852_v24 = vpop.xlane.xlu0 %851 }
 0x5b1   : > { %v853_v25 = vmul.f32 %v852_v24, %v1338_v8 }
 0x5b3   : > { %v854_v26 = vsub.f32 %v1433_v22, %v853_v25 }
 0x5b5   : > { %v855_v27 = vmul.f32 %v854_v26, %v854_v26 }
 0x5b7   : > { %v856_v28 = vsel %vm412_vm0, %v855_v27, 0.0 }
 0x5b8   : > { %857 = vadd.xlane.f32.xlu1 %v856_v28 }
 0x62b   : > { %v858_v35 = vpop.xlane.xlu1 %857 }
 0x62c   : > { %v859_v36 = vmul.f32 %v858_v35, %v1338_v8  ;;  %v921_v8 = vld [vmem:[%s1558_s10 + $0x48] sm:$0xff] }
 0x62d   : > { %938 = vmatpush.msra.mxu0 %v921_v8 }
 0x62e   : > { %v860_v38 = vadd.f32 1e-05, %v859_v36 }
 0x62f   : > { %939 = vmatpush.msra.mxu0 %v920_v41 }
 0x630   : > { %1135 = vrsqrt.f32 %v860_v38  ;;  %vm867_vm11 = vweird.f32 %v860_v38 }
 0x631   : > { %940 = vmatpush.msra.mxu0 %v919_v43 }
 0x633   : > { %941 = vmatpush.msra.mxu0 %v918_v45 }
 0x635   : > { %942 = vmatpush.msra.mxu0 %v917_v47 }
 0x636   : > { %v1136_v42 = vpop.eup %1135 }
 0x637   : > { %v862_v44 = vmul.f32 %v1136_v42, %v860_v38  ;;  %vm868_vm5 = vweird.f32 %v1136_v42  ;;  %943 = vmatpush.msra.mxu0 %v916_v49 }
 0x638   : > { %vm869_vm12 = vmor %vm867_vm11, %vm868_vm5 }
 0x639   : > { %v863_v46 = vmul.f32 %v1136_v42, %v862_v44  ;;  %944 = vmatpush.msra.mxu0 %v915_v51 }
 0x63b   : > { %v864_v48 = vmul.f32 0.5, %v863_v46  ;;  %945 = vmatpush.msra.mxu0 %v914_v59 }
 0x63d   : > { %v865_v50 = vsub.f32 1.5, %v864_v48  ;;  %946 = vmatpush.msra.mxu0 %v913_v60 }
 0x63f   : > { %v866_v52 = vmul.f32 %v1136_v42, %v865_v50  ;;  %947 = vmatpush.msra.mxu0 %v912_v61 }
 0x641   : > { %v870_v54 = vsel %vm869_vm12, %v1136_v42, %v866_v52 }
 0x642   : > { %v871_v55 = vmul.f32 %v870_v54, %v854_v26 }
 0x644   : > { %v875_v57 = vmul.f32 %v1111_v53, %v871_v55 }
 0x646   : > { %v879_v58 = vadd.f32 %v1112_v56, %v875_v57 }
 0x648   : > { %1049 = vmatmul.msk.f32.vlgmr.msra.gmra.mxu3 %vm412_vm0, %v879_v58 }
 0x6cb   : > { %v908_v63 = vpop.f32.mrf.mxu3 }
 0x6cc   : > { %v909_v1 = vadd.f32 %v1113_v62, %v908_v63 }
 0x6ce   : > { %v911_v2 = vmax.f32 %v909_v1, 0.0 }
 0x6d0   : > { %948 = vmatmul.f32.vlgmr.msra.gmra.mxu0 %v911_v2 }
 0x74d   : > { %v949_v5 = vpop.f32.mrf.mxu0 }
 0x74e   : > { %v950_v6 = vadd.f32 %v1114_v3, %v949_v5 }
 0x750   : > { %v952_v7 = vadd.f32 %v950_v6, %v1433_v22 }
 0x752   : > { %953 = vst.msk [vmem:[%s404_s26] sm:$0xff] %vm412_vm0, %v952_v7 }
 0x753   : > { %1164 = shalt.err (!%p1161_p3)
}
 0x754   : > { %1054 = dma.vmem_to_hbm [thread:$0]  (%p1319_p5), %s968_s28, 128, %s970_s29, %s955_s25  }
 0x755 PF: > { %p1060_p4 = scmp.ge.s32.totalorder %s1199_s24, 2  ;;  %s981_s15 = sand.u32 1, %s1187_s21  }
 0x756   : > { %s982_s20 = scalar_lea.sflag [#allocation3], %s981_s15 }
 0x757   : > { %p1057_p7 = pnand %p1060_p4, %p1323_p6 }
 0x759   : > { %p1058_p8 = pneg %p1057_p7 }
 0x75b   : > { %1182 = dma.done.wait (%p1058_p8), %s982_s20, 128  }
 0x75c   : > { %1184 = vsyncadd (%p1058_p8), %s982_s20, 4294967168  ;;  %p22_p9 = scmp.ge.s32.totalorder %s1306_s27, 4   ;;  %s1571_s21 = smov %s1191_s22 }
 0x75d   : > { %s1572_s22 = smov %s1195_s23  ;;  %s1573_s23 = smov %s1317_s30 }
 0x75e   : > { %s1574_s24 = smov %s1306_s27  ;;  %24 = sbr.rel (!%p22_p9) target bundleno = 7 (0x7), region = 103 }
 0x763   :  { %988 = vsyncpa [#allocation3], 1 }
 0x764   :  { %990 = vsyncpa [#allocation3 + $0x1], 1 }

</bundles_post_ra>
